<compile_context>
chip_gen: v7x
topology: tpu7x:2x2x1
jax: 0.10.0
libtpu: 0.0.40
codegen_flags: <defaults>
</compile_context>

<pallas_src>
import math

import jax
import jax.numpy as jnp
from jax.experimental import pallas as pl
from jax.experimental.pallas import tpu as pltpu

# ----- small config (consistent with ModelArgs structure) -----
DIM = 64
N_HEADS = 4
N_KV_HEADS = 4                       # n_rep = 1, as in the default ModelArgs
HEAD_DIM = DIM // N_HEADS            # 16
MULTIPLE_OF = 16
NORM_EPS = 1e-5
ROPE_THETA = 500000.0
BATCH = 2
SEQ = 8
NTOK = BATCH * SEQ

NEG_INF = -1e30

assert HEAD_DIM % 2 == 0 and DIM % HEAD_DIM == 0, "RoPE lane-roll trick needs even head_dim"


def _ffn_hidden(dim, multiple_of, ffn_dim_multiplier=None):
    hidden = 4 * dim
    hidden = int(2 * hidden / 3)
    if ffn_dim_multiplier is not None:
        hidden = int(ffn_dim_multiplier * hidden)
    return multiple_of * ((hidden + multiple_of - 1) // multiple_of)


FFN_HIDDEN = _ffn_hidden(DIM, MULTIPLE_OF)   # 176 (true hidden size)
FFN_PAD = 256                                # lane-aligned padded hidden (multiple of 128)


# ----------------------------- Pallas kernel -----------------------------
def transformer_block_kernel(
    x_ref,                 # (N, D)  N = B*S
    wqkv_ref, bqkv_ref,    # (D, 3D), (1, 3D)   (attention scale folded into the q part)
    cos_ref, sin_ref,      # (N, 2D) RoPE tables over the q|k block; sin is parity-signed
    anw_ref, fnw_ref,      # (1, D) RMSNorm weights
    bmask_ref,             # (1, N, N) additive cross-batch mask (0 same batch / -1e30 otherwise)
    wo_ref,                # (D, D) output projection
    w13_ref, b13_ref,      # (D, 2*FFN_PAD), (1, 2*FFN_PAD)
    w2_ref, b2_ref,        # (FFN_PAD, D), (1, D)
    out_ref,               # (N, D)
):
    x = x_ref[...]

    def rmsnorm(v, w):
        ms = jnp.mean(v * v, axis=-1, keepdims=True)
        return v * jax.lax.rsqrt(ms + NORM_EPS) * w

    # ----- attention branch -----
    xn = rmsnorm(x, anw_ref[...])

    # fused QKV projection: (N, D) @ (D, 3D)
    qkv = jnp.dot(xn, wqkv_ref[...], preferred_element_type=jnp.float32) + bqkv_ref[...]
    qk = qkv[:, : 2 * DIM]        # (N, 128) -- q block | k block (vreg aligned)
    v2 = qkv[:, 2 * DIM:]         # (N, 64)

    # Interleaved-pair RoPE on the full 128-lane q|k block:
    #   rot[2i]   = x[2i]*cos_i - x[2i+1]*sin_i
    #   rot[2i+1] = x[2i+1]*cos_i + x[2i]*sin_i
    # Even lanes take the +1 neighbour, odd lanes the -1 neighbour; the sin table carries the
    # sign (-s on even lanes, +s on odd lanes).  Parity masking also makes the roll wrap-around
    # (lane 0<->127, q|k seam at lane DIM) harmless.
    up = pltpu.roll(qk, 2 * DIM - 1, 1)   # lane j -> qk[j+1] (mod 128)
    dn = pltpu.roll(qk, 1, 1)             # lane j -> qk[j-1]
    lane = jax.lax.broadcasted_iota(jnp.int32, qk.shape, 1)
    partner = jnp.where((lane & 1) == 0, up, dn)
    qk_rot = qk * cos_ref[...] + partner * sin_ref[...]

    q2 = qk_rot[:, :DIM]          # (N, 64)
    k2 = qk_rot[:, DIM:]          # (N, 64)

    # Split heads along the feature axis only (batch stays merged in the token axis).
    def split_heads(t):           # (N, D) -> (H, N, HEAD_DIM)
        return jnp.stack(
            [t[:, h * HEAD_DIM:(h + 1) * HEAD_DIM] for h in range(N_HEADS)], axis=0)

    qh = split_heads(q2)          # (H, N, HEAD_DIM)
    kh = split_heads(k2)
    vh = split_heads(v2)

    # scores over all tokens; cross-batch pairs are masked out (scale already folded into wq/bq)
    s = jnp.einsum("hqd,hkd->hqk", qh, kh, preferred_element_type=jnp.float32)
    s = s + bmask_ref[...]                                   # (1,N,N) broadcast over heads
    m = jnp.max(s, axis=-1, keepdims=True)
    e = jnp.exp(s - m)
    p = e * pl.reciprocal(jnp.sum(e, axis=-1, keepdims=True), approx=True)
    o = jnp.einsum("hqk,hkd->hqd", p, vh,
                   preferred_element_type=jnp.float32)       # (H, N, HEAD_DIM)

    # reassemble heads along lanes once, then a single (N,D)@(D,D) output projection
    o_flat = jnp.concatenate([o[h] for h in range(N_HEADS)], axis=-1)   # (N, D)
    attn = jnp.dot(o_flat, wo_ref[...], preferred_element_type=jnp.float32)

    h1 = x + attn

    # ----- feed-forward branch (SwiGLU), fused W1|W3, hidden padded to 256 lanes -----
    hn = rmsnorm(h1, fnw_ref[...])
    u = jnp.dot(hn, w13_ref[...], preferred_element_type=jnp.float32) + b13_ref[...]
    a = u[:, :FFN_PAD]            # lane-aligned slices (0 and 256)
    g = u[:, FFN_PAD:]
    ff = jnp.dot(a * jax.nn.sigmoid(a) * g, w2_ref[...],
                 preferred_element_type=jnp.float32) + b2_ref[...]

    out_ref[...] = h1 + ff


def _full(shape):
    return pl.BlockSpec(shape, lambda i: (0,) * len(shape))


def transformer_block(x, packed):
    B, S, D = x.shape
    N = B * S
    xf = x.reshape(N, D)

    out = pl.pallas_call(
        transformer_block_kernel,
        out_shape=jax.ShapeDtypeStruct((N, D), jnp.float32),
        grid=(1,),
        in_specs=[
            _full((N, D)),                          # x
            _full((D, 3 * D)), _full((1, 3 * D)),   # wqkv, bqkv
            _full((N, 2 * D)), _full((N, 2 * D)),   # cosT, sinT (parity-signed)
            _full((1, D)), _full((1, D)),           # attn_norm, ffn_norm
            _full((1, N, N)),                       # cross-batch additive mask
            _full((D, D)),                          # wo
            _full((D, 2 * FFN_PAD)), _full((1, 2 * FFN_PAD)),   # w13, b13 (padded)
            _full((FFN_PAD, D)), _full((1, D)),     # w2 (padded rows), b2
        ],
        out_specs=pl.BlockSpec((N, D), lambda i: (0, 0)),
        compiler_params=pltpu.CompilerParams(dimension_semantics=("arbitrary",)),
    )(
        xf,
        packed["wqkv"], packed["bqkv"],
        packed["cosT"], packed["sinT"],
        packed["anw"], packed["fnw"],
        packed["bmask"],
        packed["wo"],
        packed["w13"], packed["b13"],
        packed["w2"], packed["b2"],
    )
    return out.reshape(B, S, D)


# --------------------- parameter / table setup (host-side glue) ---------------------
def make_rope_base():
    k = jnp.arange(HEAD_DIM // 2, dtype=jnp.float32)
    inv_freq = 1.0 / (ROPE_THETA ** (2.0 * k / HEAD_DIM))        # (hd/2,)
    t = jnp.arange(SEQ, dtype=jnp.float32)
    ang = jnp.outer(t, inv_freq)                                 # (S, hd/2)
    return jnp.cos(ang), jnp.sin(ang)


def make_params(key):
    ks = jax.random.split(key, 10)
    sc = 0.05
    p = {
        "wq": sc * jax.random.normal(ks[0], (DIM, DIM), jnp.float32),
        "bq": sc * jax.random.normal(ks[1], (1, DIM), jnp.float32),
        "wk": sc * jax.random.normal(ks[2], (DIM, DIM), jnp.float32),
        "wv": sc * jax.random.normal(ks[3], (DIM, DIM), jnp.float32),
        "wo": sc * jax.random.normal(ks[4], (DIM, DIM), jnp.float32),
        "w1": sc * jax.random.normal(ks[5], (DIM, FFN_HIDDEN), jnp.float32),
        "w3": sc * jax.random.normal(ks[6], (DIM, FFN_HIDDEN), jnp.float32),
        "b3": sc * jax.random.normal(ks[7], (1, FFN_HIDDEN), jnp.float32),
        "w2": sc * jax.random.normal(ks[8], (FFN_HIDDEN, DIM), jnp.float32),
        "b2": sc * jax.random.normal(ks[9], (1, DIM), jnp.float32),
        "attn_norm": jnp.ones((1, DIM), jnp.float32),
        "ffn_norm": jnp.ones((1, DIM), jnp.float32),
    }
    cos, sin = make_rope_base()
    p["_rope_cos"], p["_rope_sin"] = cos, sin
    return p


def pack_params(p):
    """Host-side packing: fuse weights, fold the attention scale, build RoPE / mask tables,
    zero-pad the FFN hidden dimension to a 128-lane multiple."""
    scale = 1.0 / math.sqrt(HEAD_DIM)
    cos, sin = p["_rope_cos"], p["_rope_sin"]

    # per-head interleaved-layout tables (S, HEAD_DIM)
    cos_h = jnp.repeat(cos, 2, axis=-1)                               # [c0,c0,c1,c1,...]
    sin_h = jnp.stack([-sin, sin], axis=-1).reshape(SEQ, HEAD_DIM)    # [-s0,+s0,-s1,+s1,...]
    tileqk = lambda t: jnp.tile(t, (BATCH, 2 * N_HEADS))              # (B*S, 2*D)

    # FFN padding (exact zeros -> numerically identical)
    pad_c = FFN_PAD - FFN_HIDDEN
    w1p = jnp.pad(p["w1"], ((0, 0), (0, pad_c)))
    w3p = jnp.pad(p["w3"], ((0, 0), (0, pad_c)))
    b3p = jnp.pad(p["b3"], ((0, 0), (0, pad_c)))
    w2p = jnp.pad(p["w2"], ((0, pad_c), (0, 0)))

    # cross-batch additive mask over the merged token axis
    bid = jnp.arange(NTOK) // SEQ
    bmask = jnp.where(bid[:, None] == bid[None, :], 0.0, NEG_INF).astype(jnp.float32)[None]

    return {
        "wqkv": jnp.concatenate([p["wq"] * scale, p["wk"], p["wv"]], axis=1),
        "bqkv": jnp.concatenate([p["bq"] * scale,
                                 jnp.zeros((1, DIM), jnp.float32),
                                 jnp.zeros((1, DIM), jnp.float32)], axis=1),
        "cosT": tileqk(cos_h), "sinT": tileqk(sin_h),
        "anw": p["attn_norm"], "fnw": p["ffn_norm"],
        "bmask": bmask,
        "wo": p["wo"],
        "w13": jnp.concatenate([w1p, w3p], axis=1),                   # (D, 2*FFN_PAD)
        "b13": jnp.concatenate([jnp.zeros((1, FFN_PAD), jnp.float32), b3p], axis=1),
        "w2": w2p, "b2": p["b2"],
    }


# --------------- pure-JAX reference (mirrors the PyTorch forward, mask=None) ---------------
def reference_block(x, p):
    def rmsnorm(v, w):
        ms = jnp.mean(v * v, axis=-1, keepdims=True)
        return v * jax.lax.rsqrt(ms + NORM_EPS) * w

    B, S, _ = x.shape
    xn = rmsnorm(x, p["attn_norm"])
    q = xn @ p["wq"] + p["bq"]
    k = xn @ p["wk"]
    v = xn @ p["wv"]
    q = q.reshape(B, S, N_HEADS, HEAD_DIM)
    k = k.reshape(B, S, N_KV_HEADS, HEAD_DIM)
    v = v.reshape(B, S, N_KV_HEADS, HEAD_DIM)

    cos, sin = p["_rope_cos"], p["_rope_sin"]

    def rope(t):
        tr = t.reshape(*t.shape[:-1], HEAD_DIM // 2, 2)
        t0, t1 = tr[..., 0], tr[..., 1]
        c = cos[None, :, None, :]
        s = sin[None, :, None, :]
        return jnp.stack([t0 * c - t1 * s, t0 * s + t1 * c], axis=-1).reshape(t.shape)

    q, k = rope(q), rope(k)
    q = q.transpose(0, 2, 1, 3)
    k = k.transpose(0, 2, 1, 3)
    v = v.transpose(0, 2, 1, 3)
    s = jnp.einsum("bhqd,bhkd->bhqk", q, k) / math.sqrt(HEAD_DIM)
    attn = jax.nn.softmax(s, axis=-1)
    o = jnp.einsum("bhqk,bhkd->bhqd", attn, v)
    o = o.transpose(0, 2, 1, 3).reshape(B, S, DIM)
    h = x + o @ p["wo"]

    hn = rmsnorm(h, p["ffn_norm"])
    ff = (jax.nn.silu(hn @ p["w1"]) * (hn @ p["w3"] + p["b3"])) @ p["w2"] + p["b2"]
    return h + ff


if __name__ == "__main__":
    key = jax.random.PRNGKey(0)
    kx, kp = jax.random.split(key)
    x = jax.random.normal(kx, (BATCH, SEQ, DIM), jnp.float32)
    params = make_params(kp)
    packed = pack_params(params)

    out = jax.block_until_ready(transformer_block(x, packed))
    ref = jax.block_until_ready(reference_block(x, params))

    assert out.shape == (BATCH, SEQ, DIM)
    assert bool(jnp.all(jnp.isfinite(out)))
    max_err = float(jnp.max(jnp.abs(out - ref)))
    assert max_err < 2e-2, f"mismatch vs reference: {max_err}"

    print("KERNEL_OK")
</pallas_src>

<mosaic_0001>
module attributes {stable_mosaic.version = 11 : i64} {
  func.func @transformer_block_kernel(%arg0: i32, %arg1: memref<16x64xf32, #tpu.memory_space<vmem>>, %arg2: memref<64x192xf32, #tpu.memory_space<vmem>>, %arg3: memref<1x192xf32, #tpu.memory_space<vmem>>, %arg4: memref<16x128xf32, #tpu.memory_space<vmem>>, %arg5: memref<16x128xf32, #tpu.memory_space<vmem>>, %arg6: memref<1x64xf32, #tpu.memory_space<vmem>>, %arg7: memref<1x64xf32, #tpu.memory_space<vmem>>, %arg8: memref<1x16x16xf32, #tpu.memory_space<vmem>>, %arg9: memref<64x64xf32, #tpu.memory_space<vmem>>, %arg10: memref<64x512xf32, #tpu.memory_space<vmem>>, %arg11: memref<1x512xf32, #tpu.memory_space<vmem>>, %arg12: memref<256x64xf32, #tpu.memory_space<vmem>>, %arg13: memref<1x64xf32, #tpu.memory_space<vmem>>, %arg14: memref<16x64xf32, #tpu.memory_space<vmem>>) attributes {dimension_semantics = [#tpu.dimension_semantics<arbitrary>], iteration_bounds = array<i64: 1>, scalar_prefetch = 0 : i64, scratch_operands = 0 : i64, tpu.core_type = #tpu.core_type<tc>, window_params = [{pipeline_mode = #tpu.pipeline_mode<synchronous>, transform_indices = @transform_0, window_bounds = array<i64: 16, 64>}, {pipeline_mode = #tpu.pipeline_mode<synchronous>, transform_indices = @transform_1, window_bounds = array<i64: 64, 192>}, {pipeline_mode = #tpu.pipeline_mode<synchronous>, transform_indices = @transform_2, window_bounds = array<i64: 1, 192>}, {pipeline_mode = #tpu.pipeline_mode<synchronous>, transform_indices = @transform_3, window_bounds = array<i64: 16, 128>}, {pipeline_mode = #tpu.pipeline_mode<synchronous>, transform_indices = @transform_4, window_bounds = array<i64: 16, 128>}, {pipeline_mode = #tpu.pipeline_mode<synchronous>, transform_indices = @transform_5, window_bounds = array<i64: 1, 64>}, {pipeline_mode = #tpu.pipeline_mode<synchronous>, transform_indices = @transform_6, window_bounds = array<i64: 1, 64>}, {pipeline_mode = #tpu.pipeline_mode<synchronous>, transform_indices = @transform_7, window_bounds = array<i64: 1, 16, 16>}, {pipeline_mode = #tpu.pipeline_mode<synchronous>, transform_indices = @transform_8, window_bounds = array<i64: 64, 64>}, {pipeline_mode = #tpu.pipeline_mode<synchronous>, transform_indices = @transform_9, window_bounds = array<i64: 64, 512>}, {pipeline_mode = #tpu.pipeline_mode<synchronous>, transform_indices = @transform_10, window_bounds = array<i64: 1, 512>}, {pipeline_mode = #tpu.pipeline_mode<synchronous>, transform_indices = @transform_11, window_bounds = array<i64: 256, 64>}, {pipeline_mode = #tpu.pipeline_mode<synchronous>, transform_indices = @transform_12, window_bounds = array<i64: 1, 64>}, {pipeline_mode = #tpu.pipeline_mode<synchronous>, transform_indices = @transform_13, window_bounds = array<i64: 16, 64>}]} {
    %c0 = arith.constant 0 : index
    %c0_0 = arith.constant 0 : index
    %0 = vector.load %arg1[%c0, %c0_0] : memref<16x64xf32, #tpu.memory_space<vmem>>, vector<16x64xf32>
    %c0_1 = arith.constant 0 : index
    %c0_2 = arith.constant 0 : index
    %1 = vector.load %arg6[%c0_1, %c0_2] : memref<1x64xf32, #tpu.memory_space<vmem>>, vector<1x64xf32>
    %2 = arith.mulf %0, %0 : vector<16x64xf32>
    %cst = arith.constant dense<0.000000e+00> : vector<16xf32>
    %3 = vector.multi_reduction <add>, %2, %cst [1] : vector<16x64xf32> to vector<16xf32>
    %4 = vector.shape_cast %3 : vector<16xf32> to vector<16x1xf32>
    %cst_3 = arith.constant 6.400000e+01 : f32
    %5 = vector.broadcast %cst_3 : f32 to vector<16x1xf32>
    %6 = arith.divf %4, %5 : vector<16x1xf32>
    %cst_4 = arith.constant 9.99999974E-6 : f32
    %7 = vector.broadcast %cst_4 : f32 to vector<16x1xf32>
    %8 = arith.addf %6, %7 : vector<16x1xf32>
    %9 = math.rsqrt %8 : vector<16x1xf32>
    %10 = vector.broadcast %9 : vector<16x1xf32> to vector<16x64xf32>
    %11 = arith.mulf %0, %10 : vector<16x64xf32>
    %12 = vector.broadcast %1 : vector<1x64xf32> to vector<16x64xf32>
    %13 = arith.mulf %11, %12 : vector<16x64xf32>
    %c0_5 = arith.constant 0 : index
    %c0_6 = arith.constant 0 : index
    %14 = vector.load %arg2[%c0_5, %c0_6] : memref<64x192xf32, #tpu.memory_space<vmem>>, vector<64x192xf32>
    %cst_7 = arith.constant dense<0.000000e+00> : vector<16x192xf32>
    %15 = tpu.matmul %13, %14, %cst_7 {dimension_numbers = #tpu.dot_dimension_numbers<[1], [0], [0], [1], [0, 0, 1, 1], [], []>} : vector<16x64xf32>, vector<64x192xf32>, vector<16x192xf32> -> vector<16x192xf32>
    %c0_8 = arith.constant 0 : index
    %c0_9 = arith.constant 0 : index
    %16 = vector.load %arg3[%c0_8, %c0_9] : memref<1x192xf32, #tpu.memory_space<vmem>>, vector<1x192xf32>
    %17 = vector.broadcast %16 : vector<1x192xf32> to vector<16x192xf32>
    %18 = arith.addf %15, %17 : vector<16x192xf32>
    %19 = vector.extract_strided_slice %18 {offsets = [0, 0], sizes = [16, 128], strides = [1, 1]} : vector<16x192xf32> to vector<16x128xf32>
    %20 = vector.extract_strided_slice %18 {offsets = [0, 128], sizes = [16, 64], strides = [1, 1]} : vector<16x192xf32> to vector<16x64xf32>
    %c127_i32 = arith.constant 127 : i32
    %21 = tpu.dynamic_rotate %19 by %c127_i32 dim 1 : vector<16x128xf32>, i32 -> vector<16x128xf32>
    %c1_i32 = arith.constant 1 : i32
    %22 = tpu.dynamic_rotate %19 by %c1_i32 dim 1 : vector<16x128xf32>, i32 -> vector<16x128xf32>
    %23 = tpu.iota {dimensions = array<i32: 1>} : vector<16x128xi32>
    %c1_i32_10 = arith.constant 1 : i32
    %24 = vector.broadcast %c1_i32_10 : i32 to vector<16x128xi32>
    %25 = arith.andi %23, %24 : vector<16x128xi32>
    %c0_i32 = arith.constant 0 : i32
    %26 = vector.broadcast %c0_i32 : i32 to vector<16x128xi32>
    %27 = arith.cmpi eq, %25, %26 : vector<16x128xi32>
    %28 = arith.select %27, %21, %22 : vector<16x128xi1>, vector<16x128xf32>
    %c0_11 = arith.constant 0 : index
    %c0_12 = arith.constant 0 : index
    %29 = vector.load %arg4[%c0_11, %c0_12] : memref<16x128xf32, #tpu.memory_space<vmem>>, vector<16x128xf32>
    %30 = arith.mulf %19, %29 : vector<16x128xf32>
    %c0_13 = arith.constant 0 : index
    %c0_14 = arith.constant 0 : index
    %31 = vector.load %arg5[%c0_13, %c0_14] : memref<16x128xf32, #tpu.memory_space<vmem>>, vector<16x128xf32>
    %32 = arith.mulf %28, %31 : vector<16x128xf32>
    %33 = arith.addf %30, %32 : vector<16x128xf32>
    %34 = vector.extract_strided_slice %33 {offsets = [0, 0], sizes = [16, 64], strides = [1, 1]} : vector<16x128xf32> to vector<16x64xf32>
    %35 = vector.extract_strided_slice %33 {offsets = [0, 64], sizes = [16, 64], strides = [1, 1]} : vector<16x128xf32> to vector<16x64xf32>
    %36 = vector.extract_strided_slice %34 {offsets = [0, 0], sizes = [16, 16], strides = [1, 1]} : vector<16x64xf32> to vector<16x16xf32>
    %37 = vector.extract_strided_slice %34 {offsets = [0, 16], sizes = [16, 16], strides = [1, 1]} : vector<16x64xf32> to vector<16x16xf32>
    %38 = vector.extract_strided_slice %34 {offsets = [0, 32], sizes = [16, 16], strides = [1, 1]} : vector<16x64xf32> to vector<16x16xf32>
    %39 = vector.extract_strided_slice %34 {offsets = [0, 48], sizes = [16, 16], strides = [1, 1]} : vector<16x64xf32> to vector<16x16xf32>
    %40 = vector.shape_cast %36 : vector<16x16xf32> to vector<1x16x16xf32>
    %41 = vector.shape_cast %37 : vector<16x16xf32> to vector<1x16x16xf32>
    %42 = vector.shape_cast %38 : vector<16x16xf32> to vector<1x16x16xf32>
    %43 = vector.shape_cast %39 : vector<16x16xf32> to vector<1x16x16xf32>
    %44 = tpu.concatenate %40, %41, %42, %43 in 0 : vector<1x16x16xf32>, vector<1x16x16xf32>, vector<1x16x16xf32>, vector<1x16x16xf32> -> vector<4x16x16xf32>
    %45 = vector.extract_strided_slice %35 {offsets = [0, 0], sizes = [16, 16], strides = [1, 1]} : vector<16x64xf32> to vector<16x16xf32>
    %46 = vector.extract_strided_slice %35 {offsets = [0, 16], sizes = [16, 16], strides = [1, 1]} : vector<16x64xf32> to vector<16x16xf32>
    %47 = vector.extract_strided_slice %35 {offsets = [0, 32], sizes = [16, 16], strides = [1, 1]} : vector<16x64xf32> to vector<16x16xf32>
    %48 = vector.extract_strided_slice %35 {offsets = [0, 48], sizes = [16, 16], strides = [1, 1]} : vector<16x64xf32> to vector<16x16xf32>
    %49 = vector.shape_cast %45 : vector<16x16xf32> to vector<1x16x16xf32>
    %50 = vector.shape_cast %46 : vector<16x16xf32> to vector<1x16x16xf32>
    %51 = vector.shape_cast %47 : vector<16x16xf32> to vector<1x16x16xf32>
    %52 = vector.shape_cast %48 : vector<16x16xf32> to vector<1x16x16xf32>
    %53 = tpu.concatenate %49, %50, %51, %52 in 0 : vector<1x16x16xf32>, vector<1x16x16xf32>, vector<1x16x16xf32>, vector<1x16x16xf32> -> vector<4x16x16xf32>
    %54 = vector.extract_strided_slice %20 {offsets = [0, 0], sizes = [16, 16], strides = [1, 1]} : vector<16x64xf32> to vector<16x16xf32>
    %55 = vector.extract_strided_slice %20 {offsets = [0, 16], sizes = [16, 16], strides = [1, 1]} : vector<16x64xf32> to vector<16x16xf32>
    %56 = vector.extract_strided_slice %20 {offsets = [0, 32], sizes = [16, 16], strides = [1, 1]} : vector<16x64xf32> to vector<16x16xf32>
    %57 = vector.extract_strided_slice %20 {offsets = [0, 48], sizes = [16, 16], strides = [1, 1]} : vector<16x64xf32> to vector<16x16xf32>
    %58 = vector.shape_cast %54 : vector<16x16xf32> to vector<1x16x16xf32>
    %59 = vector.shape_cast %55 : vector<16x16xf32> to vector<1x16x16xf32>
    %60 = vector.shape_cast %56 : vector<16x16xf32> to vector<1x16x16xf32>
    %61 = vector.shape_cast %57 : vector<16x16xf32> to vector<1x16x16xf32>
    %62 = tpu.concatenate %58, %59, %60, %61 in 0 : vector<1x16x16xf32>, vector<1x16x16xf32>, vector<1x16x16xf32>, vector<1x16x16xf32> -> vector<4x16x16xf32>
    "tpu.trace_start"() <{level = 10 : i32, message = "hqd,hkd->hqk"}> : () -> ()
    %cst_15 = arith.constant dense<0.000000e+00> : vector<4x16x16xf32>
    %63 = tpu.matmul %44, %53, %cst_15 {dimension_numbers = #tpu.dot_dimension_numbers<[2], [2], [1], [1], [0, 0, 0, 1, 1, 1], [0], [0]>} : vector<4x16x16xf32>, vector<4x16x16xf32>, vector<4x16x16xf32> -> vector<4x16x16xf32>
    "tpu.trace_stop"() : () -> ()
    %c0_16 = arith.constant 0 : index
    %c0_17 = arith.constant 0 : index
    %c0_18 = arith.constant 0 : index
    %64 = vector.load %arg8[%c0_16, %c0_17, %c0_18] : memref<1x16x16xf32, #tpu.memory_space<vmem>>, vector<1x16x16xf32>
    %65 = vector.broadcast %64 : vector<1x16x16xf32> to vector<4x16x16xf32>
    %66 = arith.addf %63, %65 : vector<4x16x16xf32>
    %cst_19 = arith.constant dense<0xFF800000> : vector<4x16xf32>
    %67 = vector.multi_reduction <maximumf>, %66, %cst_19 [2] : vector<4x16x16xf32> to vector<4x16xf32>
    %68 = vector.shape_cast %67 : vector<4x16xf32> to vector<4x16x1xf32>
    %69 = vector.broadcast %68 : vector<4x16x1xf32> to vector<4x16x16xf32>
    %70 = arith.subf %66, %69 : vector<4x16x16xf32>
    %71 = math.exp %70 : vector<4x16x16xf32>
    %cst_20 = arith.constant dense<0.000000e+00> : vector<4x16xf32>
    %72 = vector.multi_reduction <add>, %71, %cst_20 [2] : vector<4x16x16xf32> to vector<4x16xf32>
    %73 = vector.shape_cast %72 : vector<4x16xf32> to vector<4x16x1xf32>
    %74 = tpu.reciprocal %73 {approx = true} : vector<4x16x1xf32> -> vector<4x16x1xf32>
    %75 = vector.broadcast %74 : vector<4x16x1xf32> to vector<4x16x16xf32>
    %76 = arith.mulf %71, %75 : vector<4x16x16xf32>
    "tpu.trace_start"() <{level = 10 : i32, message = "hqk,hkd->hqd"}> : () -> ()
    %cst_21 = arith.constant dense<0.000000e+00> : vector<4x16x16xf32>
    %77 = tpu.matmul %76, %62, %cst_21 {dimension_numbers = #tpu.dot_dimension_numbers<[2], [1], [1], [2], [0, 0, 0, 1, 1, 2], [0], [0]>} : vector<4x16x16xf32>, vector<4x16x16xf32>, vector<4x16x16xf32> -> vector<4x16x16xf32>
    "tpu.trace_stop"() : () -> ()
    %78 = vector.extract_strided_slice %77 {offsets = [0, 0, 0], sizes = [1, 16, 16], strides = [1, 1, 1]} : vector<4x16x16xf32> to vector<1x16x16xf32>
    %79 = vector.shape_cast %78 : vector<1x16x16xf32> to vector<16x16xf32>
    %80 = vector.extract_strided_slice %77 {offsets = [1, 0, 0], sizes = [1, 16, 16], strides = [1, 1, 1]} : vector<4x16x16xf32> to vector<1x16x16xf32>
    %81 = vector.shape_cast %80 : vector<1x16x16xf32> to vector<16x16xf32>
    %82 = vector.extract_strided_slice %77 {offsets = [2, 0, 0], sizes = [1, 16, 16], strides = [1, 1, 1]} : vector<4x16x16xf32> to vector<1x16x16xf32>
    %83 = vector.shape_cast %82 : vector<1x16x16xf32> to vector<16x16xf32>
    %84 = vector.extract_strided_slice %77 {offsets = [3, 0, 0], sizes = [1, 16, 16], strides = [1, 1, 1]} : vector<4x16x16xf32> to vector<1x16x16xf32>
    %85 = vector.shape_cast %84 : vector<1x16x16xf32> to vector<16x16xf32>
    %86 = tpu.concatenate %79, %81, %83, %85 in 1 : vector<16x16xf32>, vector<16x16xf32>, vector<16x16xf32>, vector<16x16xf32> -> vector<16x64xf32>
    %c0_22 = arith.constant 0 : index
    %c0_23 = arith.constant 0 : index
    %87 = vector.load %arg9[%c0_22, %c0_23] : memref<64x64xf32, #tpu.memory_space<vmem>>, vector<64x64xf32>
    %cst_24 = arith.constant dense<0.000000e+00> : vector<16x64xf32>
    %88 = tpu.matmul %86, %87, %cst_24 {dimension_numbers = #tpu.dot_dimension_numbers<[1], [0], [0], [1], [0, 0, 1, 1], [], []>} : vector<16x64xf32>, vector<64x64xf32>, vector<16x64xf32> -> vector<16x64xf32>
    %89 = arith.addf %0, %88 : vector<16x64xf32>
    %c0_25 = arith.constant 0 : index
    %c0_26 = arith.constant 0 : index
    %90 = vector.load %arg7[%c0_25, %c0_26] : memref<1x64xf32, #tpu.memory_space<vmem>>, vector<1x64xf32>
    %91 = arith.mulf %89, %89 : vector<16x64xf32>
    %cst_27 = arith.constant dense<0.000000e+00> : vector<16xf32>
    %92 = vector.multi_reduction <add>, %91, %cst_27 [1] : vector<16x64xf32> to vector<16xf32>
    %93 = vector.shape_cast %92 : vector<16xf32> to vector<16x1xf32>
    %cst_28 = arith.constant 6.400000e+01 : f32
    %94 = vector.broadcast %cst_28 : f32 to vector<16x1xf32>
    %95 = arith.divf %93, %94 : vector<16x1xf32>
    %cst_29 = arith.constant 9.99999974E-6 : f32
    %96 = vector.broadcast %cst_29 : f32 to vector<16x1xf32>
    %97 = arith.addf %95, %96 : vector<16x1xf32>
    %98 = math.rsqrt %97 : vector<16x1xf32>
    %99 = vector.broadcast %98 : vector<16x1xf32> to vector<16x64xf32>
    %100 = arith.mulf %89, %99 : vector<16x64xf32>
    %101 = vector.broadcast %90 : vector<1x64xf32> to vector<16x64xf32>
    %102 = arith.mulf %100, %101 : vector<16x64xf32>
    %c0_30 = arith.constant 0 : index
    %c0_31 = arith.constant 0 : index
    %103 = vector.load %arg10[%c0_30, %c0_31] : memref<64x512xf32, #tpu.memory_space<vmem>>, vector<64x512xf32>
    %cst_32 = arith.constant dense<0.000000e+00> : vector<16x512xf32>
    %104 = tpu.matmul %102, %103, %cst_32 {dimension_numbers = #tpu.dot_dimension_numbers<[1], [0], [0], [1], [0, 0, 1, 1], [], []>} : vector<16x64xf32>, vector<64x512xf32>, vector<16x512xf32> -> vector<16x512xf32>
    %c0_33 = arith.constant 0 : index
    %c0_34 = arith.constant 0 : index
    %105 = vector.load %arg11[%c0_33, %c0_34] : memref<1x512xf32, #tpu.memory_space<vmem>>, vector<1x512xf32>
    %106 = vector.broadcast %105 : vector<1x512xf32> to vector<16x512xf32>
    %107 = arith.addf %104, %106 : vector<16x512xf32>
    %108 = vector.extract_strided_slice %107 {offsets = [0, 0], sizes = [16, 256], strides = [1, 1]} : vector<16x512xf32> to vector<16x256xf32>
    %109 = vector.extract_strided_slice %107 {offsets = [0, 256], sizes = [16, 256], strides = [1, 1]} : vector<16x512xf32> to vector<16x256xf32>
    %110 = arith.negf %108 : vector<16x256xf32>
    %111 = math.exp %110 : vector<16x256xf32>
    %cst_35 = arith.constant 1.000000e+00 : f32
    %112 = vector.broadcast %cst_35 : f32 to vector<16x256xf32>
    %113 = arith.addf %112, %111 : vector<16x256xf32>
    %114 = arith.divf %112, %113 : vector<16x256xf32>
    %115 = arith.mulf %108, %114 : vector<16x256xf32>
    %116 = arith.mulf %115, %109 : vector<16x256xf32>
    %c0_36 = arith.constant 0 : index
    %c0_37 = arith.constant 0 : index
    %117 = vector.load %arg12[%c0_36, %c0_37] : memref<256x64xf32, #tpu.memory_space<vmem>>, vector<256x64xf32>
    %cst_38 = arith.constant dense<0.000000e+00> : vector<16x64xf32>
    %118 = tpu.matmul %116, %117, %cst_38 {dimension_numbers = #tpu.dot_dimension_numbers<[1], [0], [0], [1], [0, 0, 1, 1], [], []>} : vector<16x256xf32>, vector<256x64xf32>, vector<16x64xf32> -> vector<16x64xf32>
    %c0_39 = arith.constant 0 : index
    %c0_40 = arith.constant 0 : index
    %119 = vector.load %arg13[%c0_39, %c0_40] : memref<1x64xf32, #tpu.memory_space<vmem>>, vector<1x64xf32>
    %120 = vector.broadcast %119 : vector<1x64xf32> to vector<16x64xf32>
    %121 = arith.addf %118, %120 : vector<16x64xf32>
    %122 = arith.addf %89, %121 : vector<16x64xf32>
    %c0_41 = arith.constant 0 : index
    %c0_42 = arith.constant 0 : index
    %123 = vector.load %arg14[%c0_41, %c0_42] : memref<16x64xf32, #tpu.memory_space<vmem>>, vector<16x64xf32>
    tpu.vector_store %arg14[%c0_41, %c0_42], %122 {strides = array<i32>} : memref<16x64xf32, #tpu.memory_space<vmem>>, vector<16x64xf32>,
    return
  }
  func.func @transform_0(%arg0: i32) -> (i32, i32) {
    %c0_i32 = arith.constant 0 : i32
    %c0_i32_0 = arith.constant 0 : i32
    %c0_i32_1 = arith.constant 0 : i32
    return %c0_i32, %c0_i32_0 : i32, i32
  }
  func.func @transform_1(%arg0: i32) -> (i32, i32) {
    %c0_i32 = arith.constant 0 : i32
    %c0_i32_0 = arith.constant 0 : i32
    %c0_i32_1 = arith.constant 0 : i32
    return %c0_i32, %c0_i32_0 : i32, i32
  }
  func.func @transform_2(%arg0: i32) -> (i32, i32) {
    %c0_i32 = arith.constant 0 : i32
    %c0_i32_0 = arith.constant 0 : i32
    %c0_i32_1 = arith.constant 0 : i32
    return %c0_i32, %c0_i32_0 : i32, i32
  }
  func.func @transform_3(%arg0: i32) -> (i32, i32) {
    %c0_i32 = arith.constant 0 : i32
    %c0_i32_0 = arith.constant 0 : i32
    %c0_i32_1 = arith.constant 0 : i32
    return %c0_i32, %c0_i32_0 : i32, i32
  }
  func.func @transform_4(%arg0: i32) -> (i32, i32) {
    %c0_i32 = arith.constant 0 : i32
    %c0_i32_0 = arith.constant 0 : i32
    %c0_i32_1 = arith.constant 0 : i32
    return %c0_i32, %c0_i32_0 : i32, i32
  }
  func.func @transform_5(%arg0: i32) -> (i32, i32) {
    %c0_i32 = arith.constant 0 : i32
    %c0_i32_0 = arith.constant 0 : i32
    %c0_i32_1 = arith.constant 0 : i32
    return %c0_i32, %c0_i32_0 : i32, i32
  }
  func.func @transform_6(%arg0: i32) -> (i32, i32) {
    %c0_i32 = arith.constant 0 : i32
    %c0_i32_0 = arith.constant 0 : i32
    %c0_i32_1 = arith.constant 0 : i32
    return %c0_i32, %c0_i32_0 : i32, i32
  }
  func.func @transform_7(%arg0: i32) -> (i32, i32, i32) {
    %c0_i32 = arith.constant 0 : i32
    %c0_i32_0 = arith.constant 0 : i32
    %c0_i32_1 = arith.constant 0 : i32
    %c0_i32_2 = arith.constant 0 : i32
    return %c0_i32, %c0_i32_0, %c0_i32_1 : i32, i32, i32
  }
  func.func @transform_8(%arg0: i32) -> (i32, i32) {
    %c0_i32 = arith.constant 0 : i32
    %c0_i32_0 = arith.constant 0 : i32
    %c0_i32_1 = arith.constant 0 : i32
    return %c0_i32, %c0_i32_0 : i32, i32
  }
  func.func @transform_9(%arg0: i32) -> (i32, i32) {
    %c0_i32 = arith.constant 0 : i32
    %c0_i32_0 = arith.constant 0 : i32
    %c0_i32_1 = arith.constant 0 : i32
    return %c0_i32, %c0_i32_0 : i32, i32
  }
  func.func @transform_10(%arg0: i32) -> (i32, i32) {
    %c0_i32 = arith.constant 0 : i32
    %c0_i32_0 = arith.constant 0 : i32
    %c0_i32_1 = arith.constant 0 : i32
    return %c0_i32, %c0_i32_0 : i32, i32
  }
  func.func @transform_11(%arg0: i32) -> (i32, i32) {
    %c0_i32 = arith.constant 0 : i32
    %c0_i32_0 = arith.constant 0 : i32
    %c0_i32_1 = arith.constant 0 : i32
    return %c0_i32, %c0_i32_0 : i32, i32
  }
  func.func @transform_12(%arg0: i32) -> (i32, i32) {
    %c0_i32 = arith.constant 0 : i32
    %c0_i32_0 = arith.constant 0 : i32
    %c0_i32_1 = arith.constant 0 : i32
    return %c0_i32, %c0_i32_0 : i32, i32
  }
  func.func @transform_13(%arg0: i32) -> (i32, i32) {
    %c0_i32 = arith.constant 0 : i32
    %c0_i32_0 = arith.constant 0 : i32
    %c0_i32_1 = arith.constant 0 : i32
    return %c0_i32, %c0_i32_0 : i32, i32
  }
}

</mosaic_0001>

<bundles_post_ra>
// kernel: tpu_custom_call.1
= control target key start
LH: loop header
LB: loop body
LE: loop exit
PB: predicated region body
PF: predicated region fallthrough
CT: control target
= control target key end

     0   :  { %18 = vsyncpa [#allocation3], 0  ;;  %s2761_s0 = inlined_call_operand.vmem [shape: f32[16,64], index: 0, kind: input, shape index: {}]   ;;  %s2762_s1 = inlined_call_operand.vmem [shape: f32[64,192], index: 1, kind: input, shape index: {}]   ;;  %s2763_s2 = inlined_call_operand.hbm [shape: f32[1,192], index: 2, kind: input, shape index: {}]   ;;  %s2764_s3 = inlined_call_operand.vmem [shape: f32[16,128], index: 3, kind: input, shape index: {}]   ;;  %s2765_s4 = inlined_call_operand.hbm [shape: f32[16,128], index: 4, kind: input, shape index: {}]   ;;  %s2766_s5 = inlined_call_operand.vmem [shape: f32[1,64], index: 5, kind: input, shape index: {}]   ;;  %s2767_s6 = inlined_call_operand.hbm [shape: f32[1,64], index: 6, kind: input, shape index: {}]   ;;  %s2768_s7 = inlined_call_operand.hbm [shape: f32[1,16,16], index: 7, kind: input, shape index: {}]   ;;  %s2769_s8 = inlined_call_operand.hbm [shape: f32[64,64], index: 8, kind: input, shape index: {}]   ;;  %s2770_s9 = inlined_call_operand.vmem [shape: f32[64,512], index: 9, kind: input, shape index: {}]   ;;  %s2771_s10 = inlined_call_operand.vmem [shape: f32[1,512], index: 10, kind: input, shape index: {}]   ;;  %s2772_s11 = inlined_call_operand.vmem [shape: f32[256,64], index: 11, kind: input, shape index: {}]   ;;  %s2773_s12 = inlined_call_operand.vmem [shape: f32[1,64], index: 12, kind: input, shape index: {}]   ;;  %s2774_s13 = inlined_call_operand.hbm [shape: f32[16,64], index: 13, kind: output, shape index: {}]  }
   0x1   :  { %19 = vsyncpa [#allocation6], 0 }
   0x2   :  { %20 = vsyncpa [#allocation9], 0 }
   0x3   :  { %21 = vsyncpa [#allocation4], 0  ;;  %s2180_s25 = smov [#allocation5]   ;;  %s2040_s29 = scalar_lea.hbm %s2765_s4, 256 }
   0x4   :  { %s43_s26 = sshll.u32 %s2180_s25, 4  ;;  %p2041_p0 = scmp.ne.s32.totalorder %s2765_s4, %s2040_s29  ;;  %s44_s26 = int_to_ptr.vmem [resolvable:$true] %s43_s26 }
   0x5   :  { %p2044_p1 = scmp.lt.u32.totalorder %s2040_s29, %s2765_s4 }
   0x7   :  { %p2046_p2 = pnand %p2044_p1, %p2041_p0 }
   0x9   :  { %2049 = shalt.err (!%p2046_p2)
}
   0xa   :  { %s2050_s17 = scalar_lea.vmem %s44_s26, 256  ;;  %p2055_p4 = scmp.lt.s32.totalorder %s44_s26, %s44_s26 }
   0xb   :  { %p2051_p3 = scmp.ne.s32.totalorder %s44_s26, %s2050_s17  ;;  %p2056_p5 = scmp.lt.s32.totalorder %s2050_s17, %s2050_s17 }
   0xd   :  { %p2057_p6 = por %p2056_p5, %p2055_p4 }
   0xf   :  { %p2058_p7 = pnand %p2057_p6, %p2051_p3 }
  0x11   :  { %2061 = shalt.err (!%p2058_p7)
}
  0x12   :  { %s2181_s18 = smov 128   ;;  %s2182_s19 = smov 8  }
  0x13   :  { %49 = dma.hbm_to_vmem [thread:$0]  %s2765_s4, 256, %s44_s26, [#allocation6], %s2181_s18, %s2181_s18, %s2182_s19  }
  0x14   :  { %s2183_s22 = smov [#allocation8]   ;;  %s2184_s24 = smov [#allocation2]  }
  0x15   :  { %s67_s23 = sshll.u32 %s2183_s22, 4  ;;  %s32_s25 = sshll.u32 %s2184_s24, 4  ;;  %s68_s23 = int_to_ptr.vmem [resolvable:$true] %s67_s23  ;;  %s33_s25 = int_to_ptr.vmem [resolvable:$true] %s32_s25 }
  0x16   :  { %s2062_s29 = scalar_lea.hbm %s2768_s7, 256 }
  0x17   :  { %p2063_p8 = scmp.ne.s32.totalorder %s2768_s7, %s2062_s29  ;;  %p2066_p9 = scmp.lt.u32.totalorder %s2062_s29, %s2768_s7 }
  0x19   :  { %p2068_p10 = pnand %p2066_p9, %p2063_p8 }
  0x1b   :  { %2071 = shalt.err (!%p2068_p10)
}
  0x1c   :  { %s2072_s4 = scalar_lea.vmem %s68_s23, 256  ;;  %p2077_p12 = scmp.lt.s32.totalorder %s68_s23, %s68_s23 }
  0x1d   :  { %p2073_p11 = scmp.ne.s32.totalorder %s68_s23, %s2072_s4  ;;  %p2078_p13 = scmp.lt.s32.totalorder %s2072_s4, %s2072_s4 }
  0x1f   :  { %p2079_p0 = por %p2078_p13, %p2077_p12 }
  0x21   :  { %p2080_p1 = pnand %p2079_p0, %p2073_p11 }
  0x23   :  { %2083 = shalt.err (!%p2080_p1)
}
  0x24   :  { %73 = dma.hbm_to_vmem [thread:$0]  %s2768_s7, 256, %s68_s23, [#allocation9], %s2181_s18, %s2181_s18, %s2182_s19  }
  0x25   :  { %s2084_s22 = scalar_lea.hbm %s2763_s2, 32 }
  0x26   :  { %p2085_p2 = scmp.ne.s32.totalorder %s2763_s2, %s2084_s22  ;;  %p2088_p3 = scmp.lt.u32.totalorder %s2084_s22, %s2763_s2 }
  0x28   :  { %p2090_p4 = pnand %p2088_p3, %p2085_p2 }
  0x2a   :  { %2093 = shalt.err (!%p2090_p4)
}
  0x2b   :  { %s2094_s30 = scalar_lea.vmem %s33_s25, 32  ;;  %p2099_p6 = scmp.lt.s32.totalorder %s33_s25, %s33_s25 }
  0x2c   :  { %p2095_p5 = scmp.ne.s32.totalorder %s33_s25, %s2094_s30  ;;  %p2100_p7 = scmp.lt.s32.totalorder %s2094_s30, %s2094_s30 }
  0x2e   :  { %p2101_p8 = por %p2100_p7, %p2099_p6 }
  0x30   :  { %p2102_p9 = pnand %p2101_p8, %p2095_p5 }
  0x32   :  { %2105 = shalt.err (!%p2102_p9)
}
  0x33   :  { %35 = dma.hbm_to_vmem [thread:$0]  %s2763_s2, 32, %s33_s25, [#allocation3]  }
  0x34   :  { %s2185_s14 = smov [#allocation7]   ;;  %s2186_s16 = smov [#allocation10]  }
  0x35   :  { %s58_s15 = sshll.u32 %s2185_s14, 4  ;;  %s79_s4 = sshll.u32 %s2186_s16, 4  ;;  %s59_s15 = int_to_ptr.vmem [resolvable:$true] %s58_s15  ;;  %s80_s4 = int_to_ptr.vmem [resolvable:$true] %s79_s4 }
  0x36   :  { %s2106_s20 = scalar_lea.hbm %s2767_s6, 16 }
  0x37   :  { %p2107_p10 = scmp.ne.s32.totalorder %s2767_s6, %s2106_s20  ;;  %p2110_p11 = scmp.lt.u32.totalorder %s2106_s20, %s2767_s6 }
  0x39   :  { %p2112_p12 = pnand %p2110_p11, %p2107_p10 }
  0x3b   :  { %2115 = shalt.err (!%p2112_p12)
}
  0x3c   :  { %s2116_s2 = scalar_lea.vmem %s59_s15, 16  ;;  %s2120_s25 = scalar_lea.vmem %s59_s15, 32 }
  0x3d   :  { %p2117_p13 = scmp.ne.s32.totalorder %s59_s15, %s2116_s2  ;;  %p2121_p0 = scmp.lt.s32.totalorder %s59_s15, %s59_s15 }
  0x3e   :  { %p2122_p1 = scmp.lt.s32.totalorder %s2120_s25, %s2116_s2 }
  0x40   :  { %p2123_p2 = por %p2122_p1, %p2121_p0 }
  0x42   :  { %p2124_p3 = pnand %p2123_p2, %p2117_p13 }
  0x44   :  { %2127 = shalt.err (!%p2124_p3)
}
  0x45   :  { %61 = dma.hbm_to_vmem [thread:$0]  %s2767_s6, 16, %s59_s15, [#allocation6]  }
  0x46   :  { %s2128_s23 = scalar_lea.hbm %s2769_s8, 1024 }
  0x47   :  { %p2129_p4 = scmp.ne.s32.totalorder %s2769_s8, %s2128_s23  ;;  %p2132_p5 = scmp.lt.u32.totalorder %s2128_s23, %s2769_s8 }
  0x49   :  { %p2134_p6 = pnand %p2132_p5, %p2129_p4 }
  0x4b   :  { %2137 = shalt.err (!%p2134_p6)
}
  0x4c   :  { %s2138_s20 = scalar_lea.vmem %s80_s4, 1024  ;;  %p2143_p8 = scmp.lt.s32.totalorder %s80_s4, %s80_s4 }
  0x4d   :  { %p2139_p7 = scmp.ne.s32.totalorder %s80_s4, %s2138_s20  ;;  %p2144_p9 = scmp.lt.s32.totalorder %s2138_s20, %s2138_s20 }
  0x4f   :  { %p2145_p10 = por %p2144_p9, %p2143_p8 }
  0x51   :  { %p2146_p11 = pnand %p2145_p10, %p2139_p7 }
  0x53   :  { %2149 = shalt.err (!%p2146_p11)
}
  0x54   :  { %85 = dma.hbm_to_vmem [thread:$0]  %s2769_s8, 1024, %s80_s4, [#allocation9], %s2181_s18, %s2181_s18, %s2182_s19  }
  0x55   :  { %2172 = dma.done.wait [#allocation3], 32  }
  0x56   :  { %2173 = vsyncadd [#allocation3], 4294967264 }
  0x57   :  { %2174 = dma.done.wait [#allocation6], 272  }
  0x58   :  { %2175 = vsyncadd [#allocation6], 4294967024 }
  0x59   :  { %2176 = dma.done.wait [#allocation9], 1280  }
  0x5a   :  { %2177 = vsyncadd [#allocation9], 4294966016  ;;  %v2340_v0 = vld [vmem:[%s2761_s0] sm:$0xff]  ;;  %vm114_vm0 = vcmask 523264   ;;  %v2345_v1 = vld [vmem:[%s2761_s0 + $0x8] sm:$0xff]  ;;  %v2187_v25 = vmov 0.0   ;;  %v156_v44 = vlaneseq }
  0x5b   :  { %v112_v2 = vmul.f32 %v2340_v0, %v2340_v0  ;;  %v113_v3 = vmul.f32 %v2345_v1, %v2345_v1  ;;  %v139_v6 = vld [vmem:[%s2762_s1 + $0x8] sm:$0xff]  ;;  %v141_v7 = vld [vmem:[%s2762_s1 + $0x18] sm:$0xff]  ;;  %v138_v9 = vld [vmem:[%s2762_s1] sm:$0xff]  ;;  %236 = vmatprep.mubr.f32.mxu0 %v2187_v25  ;;  %vm313_vm2 = vcmask 130048   ;;  %s2190_s6 = smov 112   ;;  %s2191_s22 = smov 96  }
  0x5c   :  { %v1795_v8 = vpack.c.bf16 %v141_v7, %v139_v6  ;;  %v140_v10 = vld [vmem:[%s2762_s1 + $0x10] sm:$0xff]  ;;  %v143_v12 = vld [vmem:[%s2762_s1 + $0x28] sm:$0xff]  ;;  %v145_v13 = vld [vmem:[%s2762_s1 + $0x38] sm:$0xff]  ;;  %v2410_v45 = vshrl.u32 %v156_v44, 7  ;;  %v258_v61 = vand.u32 127, %v156_v44  ;;  %s2192_s24 = smov 80  }
  0x5d   :  { %v115_v4 = vsel %vm114_vm0, %v112_v2, 0.0  ;;  %v118_v5 = vsel %vm114_vm0, %v113_v3, 0.0  ;;  %v1797_v11 = vpack.c.bf16 %v140_v10, %v138_v9  ;;  %v1799_v14 = vpack.c.bf16 %v145_v13, %v143_v12  ;;  %v142_v15 = vld [vmem:[%s2762_s1 + $0x20] sm:$0xff]  ;;  %v144_v16 = vld [vmem:[%s2762_s1 + $0x30] sm:$0xff]  ;;  %v147_v18 = vld [vmem:[%s2762_s1 + $0x48] sm:$0xff]  ;;  %s2194_s27 = smov 16  }
  0x5e   :  { %116 = vadd.xlane.f32.xlu0 %v115_v4  ;;  %1796 = vmatprep.subr.bf16.mxu0 %v1795_v8  ;;  %v1801_v17 = vpack.c.bf16 %v144_v16, %v142_v15  ;;  %v149_v19 = vld [vmem:[%s2762_s1 + $0x58] sm:$0xff]  ;;  %v146_v20 = vld [vmem:[%s2762_s1 + $0x40] sm:$0xff]  ;;  %v148_v22 = vld [vmem:[%s2762_s1 + $0x50] sm:$0xff]  ;;  %v158_v46 = vsub.s32 0, %v2410_v45  ;;  %v162_v49 = vsub.s32 1, %v2410_v45  ;;  %v259_v62 = vand.u32 1, %v258_v61 }
  0x5f   :  { %1798 = vmatpush1.bf16.msra.mxu0 %v1797_v11  ;;  %v1803_v21 = vpack.c.bf16 %v149_v19, %v147_v18  ;;  %v151_v23 = vld [vmem:[%s2762_s1 + $0x68] sm:$0xff]  ;;  %v153_v24 = vld [vmem:[%s2762_s1 + $0x78] sm:$0xff]  ;;  %v1805_v26 = vpack.c.bf16 %v148_v22, %v146_v20  ;;  %v150_v28 = vld [vmem:[%s2762_s1 + $0x60] sm:$0xff]  ;;  %s2195_s8 = smov 32   ;;  %s2196_s4 = smov 48   ;;  %vm1096_vm4 = vcmask 261120  }
  0x60   :  { %1800 = vmatprep.subr.bf16.mxu0 %v1799_v14  ;;  %v1807_v27 = vpack.c.bf16 %v153_v24, %v151_v23  ;;  %v152_v29 = vld [vmem:[%s2762_s1 + $0x70] sm:$0xff]  ;;  %v1601_v38 = vld [vmem:[%s2766_s5] ss:$0 sm:$0xff]  ;;  %s2188_s1 = smov 1   ;;  %s2189_s5 = smov 127   ;;  %vm2422_vm1 = vcmp.eq.s32.totalorder %v259_v62, 0  ;;  %vm2446_vm3 = vmpackc.low %vm313_vm2, %vm313_vm2 }
  0x61   :  { %v1809_v30 = vpack.c.bf16 %v152_v29, %v150_v28  ;;  %v154_v47 = vld [vmem:[#allocation2] sm:$0x3]  ;;  %v267_v3 = vld [vmem:[#allocation5] sm:$0xff]  ;;  %v268_v12 = vld [vmem:[#allocation5 + $0x8] sm:$0xff]  ;;  %vm1099_vm5 = vcmask 392192   ;;  %s2197_s23 = smov [#allocation11]  }
  0x62   :  { %119 = vadd.xlane.f32.xlu0 %v118_v5  ;;  %v159_v48 = vrot.slane %v154_v47, %v158_v46  ;;  %v163_v53 = vrot.slane %v154_v47, %v162_v49  ;;  %v263_v2 = vld [vmem:[%s2764_s3] sm:$0xff]  ;;  %v264_v11 = vld [vmem:[%s2764_s3 + $0x8] sm:$0xff]  ;;  %s2193_s3 = smov 64   ;;  %s1587_s14 = sshll.u32 %s2197_s23, 4  ;;  %s1588_s14 = int_to_ptr.vmem [resolvable:$true] %s1587_s14 }
  0x63   :  { %1802 = vmatpush1.bf16.msra.mxu0 %v1801_v17  ;;  %s2150_s16 = scalar_lea.vmem %s1588_s14, 256  ;;  %p2155_p13 = scmp.lt.s32.totalorder %s1588_s14, %s1588_s14 }
  0x64   :  { %1804 = vmatprep.subr.bf16.mxu0 %v1803_v21  ;;  %p2151_p12 = scmp.ne.s32.totalorder %s1588_s14, %s2150_s16  ;;  %p2156_p0 = scmp.lt.s32.totalorder %s2150_s16, %s2150_s16 }
  0x66   :  { %p2157_p1 = por %p2156_p0, %p2155_p13 }
  0x67   :  { %1806 = vmatpush1.bf16.msra.mxu0 %v1805_v26 }
  0x68   :  { %1808 = vmatprep.subr.bf16.mxu0 %v1807_v27  ;;  %p2158_p2 = pnand %p2157_p1, %p2151_p12 }
  0x6b   :  { %1810 = vmatpush1.bf16.msra.mxu0 %v1809_v30 }
  0xeb   :  { %v117_v31 = vpop.xlane.xlu0 %116 }
  0xec   :  { %v122_v32 = vmul.f32 0.015625, %v117_v31 }
  0xee   :  { %v124_v33 = vadd.f32 1e-05, %v122_v32 }
  0xef   :  { %v120_v34 = vpop.xlane.xlu0 %119 }
  0xf0   :  { %1984 = vrsqrt.f32 %v124_v33  ;;  %v123_v35 = vmul.f32 0.015625, %v120_v34 }
  0xf2   :  { %v125_v36 = vadd.f32 1e-05, %v123_v35 }
  0xf4   :  { %1986 = vrsqrt.f32 %v125_v36 }
  0xfa   :  { %v1985_v37 = vpop.eup %1984 }
  0xfb   :  { %v128_v39 = vmul.f32 %v1985_v37, %v2340_v0 }
  0xfd   :  { %v136_v40 = vmul.f32 %v1601_v38, %v128_v39 }
  0xfe   :  { %v1987_v41 = vpop.eup %1986 }
  0xff   :  { %1602 = vmatmul.mubr.msk.f32.vlgmr.msra.gmra.mrb[0].mxu0 %vm114_vm0, %v136_v40  ;;  %v129_v42 = vmul.f32 %v1987_v41, %v2345_v1 }
 0x100   :  { %242 = vmatprep.mubr.f32.mxu0 %v2187_v25 }
 0x101   :  { %v137_v43 = vmul.f32 %v1601_v38, %v129_v42 }
 0x103   :  { %1603 = vmatmul.mubr.msk.f32.gmra.mrb[2].mxu0 %vm114_vm0, %v137_v43 }
 0x1d2   :  { %v238_v50 = vpop.f32.mrb[0].mxu0 }
 0x1d3   :  { %v239_v51 = vadd.f32 %v238_v50, %v159_v48  ;;  %v240_v52 = vpop.f32.mrb[1].mxu0  ;;  %v307_v50 = vld [vmem:[#allocation8] sm:$0xff] }
 0x1d4   :  { %v241_v57 = vadd.f32 %v240_v52, %v163_v53 }
 0x1d5   :  { %253 = vrot.lane.b32.xlu0 %v239_v51, %s2188_s1  ;;  %249 = vrot.lane.b32.xlu1 %v239_v51, %s2189_s5  ;;  %v265_v7 = vmul.f32 %v263_v2, %v239_v51 }
 0x1d6   :  { %v244_v54 = vpop.f32.mrb[2].mxu0 }
 0x1d7   :  { %v245_v55 = vadd.f32 %v244_v54, %v159_v48  ;;  %v246_v56 = vpop.f32.mrb[3].mxu0  ;;  %v308_v48 = vld [vmem:[#allocation8 + $0x8] sm:$0xff] }
 0x1d8   :  { %v247_v58 = vadd.f32 %v246_v56, %v163_v53 }
 0x1d9   :  { %251 = vrot.lane.b32.xlu1 %v245_v55, %s2189_s5  ;;  %v266_v15 = vmul.f32 %v264_v11, %v245_v55 }
 0x1da   :  { %v2418_v59 = vpack.c.bf16 %v247_v58, %v241_v57  ;;  %v2420_v60 = vpack.i.bf16 %v247_v58, %v241_v57 }
 0x1dd   :  { %255 = vrot.lane.b32.xlu1 %v245_v55, %s2188_s1 }
 0x247   :  { %v250_v4 = vpop.permute.xlu1 %249  ;;  %v254_v5 = vpop.permute.xlu0 %253 }
 0x248   :  { %v261_v6 = vsel %vm2422_vm1, %v250_v4, %v254_v5 }
 0x249   :  { %v269_v8 = vmul.f32 %v267_v3, %v261_v6 }
 0x24b   :  { %v271_v9 = vadd.f32 %v269_v8, %v265_v7  ;;  %v252_v10 = vpop.permute.xlu1 %251 }
 0x24d   :  { %275 = vrot.lane.b32.xlu1 %v271_v9, %s2190_s6  ;;  %1724 = vmatprep.mubr.msk.f32.mxu0 %vm313_vm2, %v271_v9 }
 0x24f   :  { %v256_v13 = vpop.permute.xlu1 %255 }
 0x250   :  { %v262_v14 = vsel %vm2422_vm1, %v252_v10, %v256_v13 }
 0x251   :  { %v270_v16 = vmul.f32 %v268_v12, %v262_v14  ;;  %279 = vrot.lane.b32.xlu1 %v271_v9, %s2191_s22 }
 0x253   :  { %v272_v17 = vadd.f32 %v270_v16, %v266_v15 }
 0x255   :  { %285 = vrot.lane.b32.xlu0 %v272_v17, %s2192_s24  ;;  %277 = vrot.lane.b32.xlu1 %v272_v17, %s2190_s6  ;;  %v1949_v18 = vpack.i.bf16 %v272_v17, %v271_v9 }
 0x259   :  { %281 = vrot.lane.b32.xlu1 %v272_v17, %s2191_s22 }
 0x25d   :  { %283 = vrot.lane.b32.xlu1 %v271_v9, %s2192_s24 }
 0x261   :  { %1950 = vrot.lane.b32.xlu1 %v1949_v18, %s2193_s3 }
 0x2bf   :  { %v276_v19 = vpop.permute.xlu1 %275 }
 0x2c0   :  { %1731 = vmatprep.mubr.msk.f32.mxu1 %vm313_vm2, %v276_v19 }
 0x2c3   :  { %v280_v20 = vpop.permute.xlu1 %279 }
 0x2c7   :  { %v278_v21 = vpop.permute.xlu1 %277  ;;  %v286_v26 = vpop.permute.xlu0 %285 }
 0x2c8   :  { %v1954_v22 = vpack.i.bf16 %v278_v21, %v276_v19 }
 0x2ca   :  { %1955 = vrot.lane.b32.xlu0 %v1954_v22, %s2193_s3 }
 0x2cb   :  { %v282_v23 = vpop.permute.xlu1 %281 }
 0x2cc   :  { %v1959_v24 = vpack.i.bf16 %v282_v23, %v280_v20 }
 0x2ce   :  { %1960 = vrot.lane.b32.xlu1 %v1959_v24, %s2193_s3 }
 0x2cf   :  { %v284_v27 = vpop.permute.xlu1 %283 }
 0x2d0   :  { %v1964_v28 = vpack.i.bf16 %v286_v26, %v284_v27 }
 0x2d2   :  { %1965 = vrot.lane.b32.xlu0 %v1964_v28, %s2193_s3 }
 0x2d3   :  { %v1951_v29 = vpop.permute.xlu1 %1950 }
 0x2d4   :  { %v1953_v30 = vunpack.i.h.bf16 %v1951_v29  ;;  %v1952_v31 = vunpack.i.l.bf16 %v1951_v29 }
 0x2d6   :  { %v1811_v33 = vpack.c.bf16 %v1953_v30, %v1952_v31 }
 0x2d8   :  { %1813 = vmatprep.subr.msk.bf16.mxu0 %vm2446_vm3, %v1811_v33 }
 0x2d9   :  { %1816 = vmatpush3.bf16.xpose.msk.msra.mxu0 %vm2446_vm3, %v1811_v33 }
 0x2e0   :  { %1725 = vmatmul.mubr.msk.f32.vlgmr.msra.gmra.mrb[4].mxu0 %vm313_vm2, %v272_v17 }
 0x2e1   :  { %1738 = vmatprep.mubr.msk.f32.mxu0 %vm313_vm2, %v280_v20 }
 0x33c   :  { %v1956_v34 = vpop.permute.xlu0 %1955 }
 0x33d   :  { %v1958_v35 = vunpack.i.h.bf16 %v1956_v34  ;;  %v1957_v36 = vunpack.i.l.bf16 %v1956_v34 }
 0x33f   :  { %v1817_v37 = vpack.c.bf16 %v1958_v35, %v1957_v36 }
 0x340   :  { %v1961_v38 = vpop.permute.xlu1 %1960 }
 0x341   :  { %v1963_v39 = vunpack.i.h.bf16 %v1961_v38  ;;  %v1962_v40 = vunpack.i.l.bf16 %v1961_v38  ;;  %1819 = vmatprep.subr.msk.bf16.mxu1 %vm2446_vm3, %v1817_v37 }
 0x342   :  { %1822 = vmatpush3.bf16.xpose.msk.msra.mxu1 %vm2446_vm3, %v1817_v37 }
 0x343   :  { %v1823_v41 = vpack.c.bf16 %v1963_v39, %v1962_v40 }
 0x344   :  { %v1966_v42 = vpop.permute.xlu0 %1965 }
 0x345   :  { %v1968_v43 = vunpack.i.h.bf16 %v1966_v42  ;;  %v1967_v44 = vunpack.i.l.bf16 %v1966_v42  ;;  %1825 = vmatprep.subr.msk.bf16.mxu0 %vm2446_vm3, %v1823_v41 }
 0x346   :  { %1828 = vmatpush3.bf16.xpose.msk.msra.mxu0 %vm2446_vm3, %v1823_v41 }
 0x347   :  { %v1829_v47 = vpack.c.bf16 %v1968_v43, %v1967_v44  ;;  %1836 = vmatprep.subr.bf16.mxu0 %v2418_v59 }
 0x349   :  { %1732 = vmatmul.mubr.msk.f32.vlgmr.msra.gmra.mrb[0].mxu1 %vm313_vm2, %v278_v21  ;;  %1831 = vmatprep.subr.msk.bf16.mxu1 %vm2446_vm3, %v1829_v47 }
 0x34a   :  { %1834 = vmatpush3.bf16.xpose.msk.msra.mxu1 %vm2446_vm3, %v1829_v47  ;;  %1745 = vmatprep.mubr.msk.f32.mxu1 %vm313_vm2, %v284_v27 }
 0x34d   :  { %1739 = vmatmul.mubr.msk.f32.vlgmr.msra.gmra.mrb[6].mxu0 %vm313_vm2, %v282_v23 }
 0x34e   :  { %1838 = vmatpush3.bf16.msra.mxu0 %v2418_v59 }
 0x351   :  { %1746 = vmatmul.mubr.msk.f32.vlgmr.msra.gmra.mrb[2].mxu1 %vm313_vm2, %v286_v26 }
 0x3b3   :  { %v1726_v51 = vpop.f32.mrb[4].mxu0 }
 0x3b4   :  { %v394_v52 = vadd.f32 %v1726_v51, %v308_v48  ;;  %v388_v53 = vpop.f32.mrb[5].mxu0 }
 0x3b5   :  { %v389_v54 = vadd.f32 %v388_v53, %v307_v50 }
 0x3b6   :  { %v661_v55 = vsel %vm313_vm2, %v394_v52, -inf }
 0x3b7   :  { %662 = vmax.xlane.f32.xlu0 %v661_v55  ;;  %v658_v56 = vsel %vm313_vm2, %v389_v54, -inf }
 0x3b8   :  { %659 = vmax.xlane.f32.xlu1 %v658_v56 }
 0x41c   :  { %v1733_v57 = vpop.f32.mrb[0].mxu1 }
 0x41d   :  { %v481_v58 = vadd.f32 %v1733_v57, %v308_v48  ;;  %v475_v61 = vpop.f32.mrb[1].mxu1 }
 0x41e   :  { %v476_v62 = vadd.f32 %v475_v61, %v307_v50 }
 0x41f   :  { %v667_v59 = vsel %vm313_vm2, %v481_v58, -inf }
 0x420   :  { %v1740_v63 = vpop.f32.mrb[6].mxu0  ;;  %668 = vmax.xlane.f32.xlu1 %v667_v59  ;;  %v664_v2 = vsel %vm313_vm2, %v476_v62, -inf }
 0x421   :  { %v568_v3 = vadd.f32 %v1740_v63, %v308_v48  ;;  %v562_v4 = vpop.f32.mrb[7].mxu0  ;;  %665 = vmax.xlane.f32.xlu0 %v664_v2 }
 0x422   :  { %v563_v5 = vadd.f32 %v562_v4, %v307_v50 }
 0x423   :  { %v673_v6 = vsel %vm313_vm2, %v568_v3, -inf }
 0x424   :  { %674 = vmax.xlane.f32.xlu1 %v673_v6  ;;  %v1747_v7 = vpop.f32.mrb[2].mxu1  ;;  %v670_v8 = vsel %vm313_vm2, %v563_v5, -inf }
 0x425   :  { %v655_v9 = vadd.f32 %v1747_v7, %v308_v48  ;;  %v649_v10 = vpop.f32.mrb[3].mxu1  ;;  %671 = vmax.xlane.f32.xlu0 %v670_v8 }
 0x426   :  { %v650_v11 = vadd.f32 %v649_v10, %v307_v50 }
 0x427   :  { %v679_v12 = vsel %vm313_vm2, %v655_v9, -inf }
 0x428   :  { %680 = vmax.xlane.f32.xlu1 %v679_v12  ;;  %v676_v13 = vsel %vm313_vm2, %v650_v11, -inf }
 0x429   :  { %677 = vmax.xlane.f32.xlu0 %v676_v13 }
 0x444   :  { %v663_v14 = vpop.xlane.xlu0 %662 }
 0x445   :  { %v683_v15 = vsub.f32 %v394_v52, %v663_v14  ;;  %v660_v16 = vpop.xlane.xlu1 %659 }
 0x446   :  { %v682_v17 = vsub.f32 %v389_v54, %v660_v16 }
 0x447   :  { %v692_v18 = vmul.f32 1.442695, %v683_v15 }
 0x448   :  { %v690_v19 = vmul.f32 1.442695, %v682_v17 }
 0x449   :  { %1988 = vpow2.f32 %v692_v18 }
 0x44a   :  { %1990 = vpow2.f32 %v690_v19 }
 0x453   :  { %v1989_v20 = vpop.eup %1988 }
 0x454   :  { %v1991_v21 = vpop.eup %1990  ;;  %v709_v22 = vsel %vm313_vm2, %v1989_v20, 0.0 }
 0x455   :  { %710 = vadd.xlane.f32.xlu1 %v709_v22  ;;  %v706_v23 = vsel %vm313_vm2, %v1991_v21, 0.0 }
 0x456   :  { %707 = vadd.xlane.f32.xlu0 %v706_v23 }
 0x4ad   :  { %v669_v24 = vpop.xlane.xlu1 %668 }
 0x4ae   :  { %v685_v26 = vsub.f32 %v481_v58, %v669_v24  ;;  %v666_v27 = vpop.xlane.xlu0 %665 }
 0x4af   :  { %v684_v28 = vsub.f32 %v476_v62, %v666_v27 }
 0x4b0   :  { %v696_v29 = vmul.f32 1.442695, %v685_v26 }
 0x4b1   :  { %v694_v30 = vmul.f32 1.442695, %v684_v28  ;;  %v675_v31 = vpop.xlane.xlu1 %674 }
 0x4b2   :  { %1992 = vpow2.f32 %v696_v29  ;;  %v687_v32 = vsub.f32 %v568_v3, %v675_v31  ;;  %v672_v33 = vpop.xlane.xlu0 %671 }
 0x4b3   :  { %1994 = vpow2.f32 %v694_v30  ;;  %v686_v34 = vsub.f32 %v563_v5, %v672_v33  ;;  %v1102_v33 = vld [vmem:[#allocation10] sm:$0xff] }
 0x4b4   :  { %v700_v35 = vmul.f32 1.442695, %v687_v32 }
 0x4b5   :  { %v698_v36 = vmul.f32 1.442695, %v686_v34  ;;  %v681_v37 = vpop.xlane.xlu1 %680  ;;  %v1103_v34 = vld [vmem:[#allocation10 + $0x8] sm:$0xff] }
 0x4b6   :  { %1996 = vpow2.f32 %v700_v35  ;;  %v689_v38 = vsub.f32 %v655_v9, %v681_v37  ;;  %v678_v39 = vpop.xlane.xlu0 %677  ;;  %v1104_v35 = vld [vmem:[#allocation10 + $0x10] sm:$0xff]  ;;  %v1105_v37 = vld [vmem:[#allocation10 + $0x18] sm:$0xff] }
 0x4b7   :  { %1998 = vpow2.f32 %v698_v36  ;;  %v688_v40 = vsub.f32 %v650_v11, %v678_v39  ;;  %v1851_v36 = vpack.c.bf16 %v1103_v34, %v1102_v33  ;;  %v1228_v34 = vld [vmem:[%s2770_s9 + $0x50] sm:$0xff] }
 0x4b8   :  { %v704_v41 = vmul.f32 1.442695, %v689_v38  ;;  %v1855_v38 = vpack.c.bf16 %v1105_v37, %v1104_v35  ;;  %v1232_v35 = vld [vmem:[%s2770_s9 + $0x70] sm:$0xff]  ;;  %v1235_v37 = vld [vmem:[%s2770_s9 + $0x88] sm:$0xff] }
 0x4b9   :  { %v702_v42 = vmul.f32 1.442695, %v688_v40 }
 0x4ba   :  { %2000 = vpow2.f32 %v704_v41  ;;  %v1106_v41 = vld [vmem:[#allocation10 + $0x20] sm:$0xff] }
 0x4bb   :  { %2002 = vpow2.f32 %v702_v42  ;;  %v1107_v42 = vld [vmem:[#allocation10 + $0x28] sm:$0xff] }
 0x4bc   :  { %v2484_v43 = vpop.eup %1992 }
 0x4bd   :  { %v1995_v44 = vpop.eup %1994  ;;  %v715_v47 = vsel %vm313_vm2, %v2484_v43, 0.0 }
 0x4be   :  { %716 = vadd.xlane.f32.xlu1 %v715_v47  ;;  %v712_v48 = vsel %vm313_vm2, %v1995_v44, 0.0  ;;  %v1109_v47 = vld [vmem:[#allocation10 + $0x38] sm:$0xff] }
 0x4bf   :  { %713 = vadd.xlane.f32.xlu0 %v712_v48 }
 0x4c0   :  { %v1997_v50 = vpop.eup %1996 }
 0x4c1   :  { %v1999_v51 = vpop.eup %1998  ;;  %v721_v52 = vsel %vm313_vm2, %v1997_v50, 0.0 }
 0x4c2   :  { %722 = vadd.xlane.f32.xlu1 %v721_v52  ;;  %v718_v53 = vsel %vm313_vm2, %v1999_v51, 0.0 }
 0x4c3   :  { %719 = vadd.xlane.f32.xlu0 %v718_v53 }
 0x4c4   :  { %v2491_v54 = vpop.eup %2000 }
 0x4c5   :  { %v2003_v55 = vpop.eup %2002  ;;  %v727_v56 = vsel %vm313_vm2, %v2491_v54, 0.0 }
 0x4c6   :  { %728 = vadd.xlane.f32.xlu1 %v727_v56  ;;  %v724_v57 = vsel %vm313_vm2, %v2003_v55, 0.0 }
 0x4c7   :  { %725 = vadd.xlane.f32.xlu0 %v724_v57 }
 0x4d7   :  { %1975 = vrot.lane.b32.xlu1 %v2420_v60, %s2191_s22 }
 0x4db   :  { %1980 = vrot.lane.b32.xlu1 %v2420_v60, %s2192_s24 }
 0x4dd   :  { %1970 = vrot.lane.b32.xlu0 %v2420_v60, %s2190_s6 }
 0x4e2   :  { %v711_v58 = vpop.xlane.xlu1 %710 }
 0x4e3   :  { %2004 = vrcp.f32 %v711_v58  ;;  %v708_v61 = vpop.xlane.xlu0 %707 }
 0x4e4   :  { %2006 = vrcp.f32 %v708_v61 }
 0x4ed   :  { %v2005_v62 = vpop.eup %2004 }
 0x4ee   :  { %v2007_v59 = vpop.eup %2006  ;;  %v739_v2 = vmul.f32 %v2005_v62, %v1989_v20 }
 0x4ef   :  { %v738_v63 = vmul.f32 %v2007_v59, %v1991_v21 }
 0x4f1   :  { %1752 = vmatprep.mubr.msk.f32.mxu0 %vm313_vm2, %v738_v63 }
 0x4f2   :  { %1753 = vmatmul.mubr.msk.f32.vlgmr.msra.gmra.mrb[8].mxu0 %vm313_vm2, %v739_v2 }
 0x54b   :  { %v717_v3 = vpop.xlane.xlu1 %716 }
 0x54c   :  { %v714_v4 = vpop.xlane.xlu0 %713 }
 0x54d   :  { %2008 = vrcp.f32 %v714_v4 }
 0x54f   :  { %v723_v5 = vpop.xlane.xlu1 %722 }
 0x550   :  { %2010 = vrcp.f32 %v723_v5  ;;  %v720_v6 = vpop.xlane.xlu0 %719 }
 0x551   :  { %2012 = vrcp.f32 %v720_v6 }
 0x552   :  { %2014 = vrcp.f32 %v717_v3 }
 0x553   :  { %v729_v60 = vpop.xlane.xlu1 %728 }
 0x554   :  { %v726_v7 = vpop.xlane.xlu0 %725 }
 0x555   :  { %2016 = vrcp.f32 %v726_v7 }
 0x556   :  { %2018 = vrcp.f32 %v729_v60 }
 0x557   :  { %v2009_v8 = vpop.eup %2008  ;;  %v1976_v9 = vpop.permute.xlu1 %1975 }
 0x558   :  { %v1978_v10 = vunpack.i.h.bf16 %v1976_v9  ;;  %v1977_v11 = vunpack.i.l.bf16 %v1976_v9  ;;  %v1971_v12 = vpop.permute.xlu0 %1970  ;;  %v740_v13 = vmul.f32 %v2009_v8, %v1995_v44  ;;  %v1108_v44 = vld [vmem:[#allocation10 + $0x30] sm:$0xff] }
 0x559   :  { %v1973_v14 = vunpack.i.h.bf16 %v1971_v12  ;;  %v1972_v15 = vunpack.i.l.bf16 %v1971_v12  ;;  %v1863_v48 = vpack.c.bf16 %v1109_v47, %v1108_v44 }
 0x55a   :  { %v2011_v16 = vpop.eup %2010  ;;  %v1843_v17 = vpack.c.bf16 %v1978_v10, %v1977_v11  ;;  %1759 = vmatprep.mubr.msk.f32.mxu1 %vm313_vm2, %v740_v13 }
 0x55b   :  { %v2013_v18 = vpop.eup %2012  ;;  %v1839_v19 = vpack.c.bf16 %v1973_v14, %v1972_v15  ;;  %v1981_v20 = vpop.permute.xlu1 %1980  ;;  %v743_v26 = vmul.f32 %v2011_v16, %v1997_v50  ;;  %v1221_v14 = vld [vmem:[%s2770_s9 + $0x18] sm:$0xff] }
 0x55c   :  { %v2015_v21 = vpop.eup %2014  ;;  %v1983_v22 = vunpack.i.h.bf16 %v1981_v20  ;;  %v1982_v23 = vunpack.i.l.bf16 %v1981_v20  ;;  %1844 = vmatprep.subr.bf16.mxu0 %v1843_v17  ;;  %v742_v24 = vmul.f32 %v2013_v18, %v1999_v51  ;;  %v1225_v16 = vld [vmem:[%s2770_s9 + $0x38] sm:$0xff]  ;;  %v1222_v18 = vld [vmem:[%s2770_s9 + $0x20] sm:$0xff] }
 0x55d   :  { %1840 = vmatprep.subr.bf16.mxu1 %v1839_v19  ;;  %1846 = vmatpush3.bf16.msra.mxu0 %v1843_v17  ;;  %v741_v29 = vmul.f32 %v2015_v21, %v2484_v43  ;;  %v1859_v43 = vpack.c.bf16 %v1107_v42, %v1106_v41  ;;  %v1218_v17 = vld [vmem:[%s2770_s9] sm:$0xff]  ;;  %v1220_v21 = vld [vmem:[%s2770_s9 + $0x10] sm:$0xff]  ;;  %v1241_v41 = vld [vmem:[%s2770_s9 + $0xb8] sm:$0xff] }
 0x55e   :  { %v1847_v27 = vpack.c.bf16 %v1983_v22, %v1982_v23  ;;  %1842 = vmatpush3.bf16.msra.mxu1 %v1839_v19  ;;  %1766 = vmatprep.mubr.msk.f32.mxu0 %vm313_vm2, %v742_v24  ;;  %v1883_v19 = vpack.c.bf16 %v1225_v16, %v1221_v14  ;;  %v1869_v20 = vpack.c.bf16 %v1222_v18, %v1218_v17  ;;  %v1224_v22 = vld [vmem:[%s2770_s9 + $0x30] sm:$0xff]  ;;  %v1227_v24 = vld [vmem:[%s2770_s9 + $0x48] sm:$0xff]  ;;  %v1234_v42 = vld [vmem:[%s2770_s9 + $0x80] sm:$0xff] }
 0x55f   :  { %v2017_v28 = vpop.eup %2016  ;;  %1852 = vmatprep.subr.bf16.mxu0 %v1851_v36  ;;  %v1885_v23 = vpack.c.bf16 %v1224_v22, %v1220_v21  ;;  %v1481_v16 = vld [vmem:[%s2772_s11 + $0x88] sm:$0xff]  ;;  %v1464_v18 = vld [vmem:[%s2772_s11] sm:$0xff]  ;;  %v1483_v21 = vld [vmem:[%s2772_s11 + $0x98] sm:$0xff] }
 0x560   :  { %v2019_v30 = vpop.eup %2018  ;;  %1767 = vmatmul.mubr.msk.f32.vlgmr.msra.gmra.mrb[10].mxu0 %vm313_vm2, %v743_v26  ;;  %1848 = vmatprep.subr.bf16.mxu1 %v1847_v27  ;;  %v744_v31 = vmul.f32 %v2017_v28, %v2003_v55  ;;  %v1231_v26 = vld [vmem:[%s2770_s9 + $0x68] sm:$0xff] }
 0x561   :  { %1760 = vmatmul.mubr.msk.f32.vlgmr.msra.gmra.mrb[4].mxu1 %vm313_vm2, %v741_v29  ;;  %v745_v32 = vmul.f32 %v2019_v30, %v2491_v54  ;;  %1854 = vmatpush3.bf16.msra.mxu0 %v1851_v36  ;;  %v1871_v28 = vpack.c.bf16 %v1231_v26, %v1227_v24  ;;  %v1233_v29 = vld [vmem:[%s2770_s9 + $0x78] sm:$0xff]  ;;  %v1226_v30 = vld [vmem:[%s2770_s9 + $0x40] sm:$0xff]  ;;  %v1889_v36 = vpack.c.bf16 %v1232_v35, %v1228_v34 }
 0x562   :  { %1850 = vmatpush3.bf16.msra.mxu1 %v1847_v27  ;;  %1773 = vmatprep.mubr.msk.f32.mxu1 %vm313_vm2, %v744_v31  ;;  %v1229_v27 = vld [vmem:[%s2770_s9 + $0x58] sm:$0xff]  ;;  %v1230_v31 = vld [vmem:[%s2770_s9 + $0x60] sm:$0xff] }
 0x563   :  { %1856 = vmatprep.subr.bf16.mxu0 %v1855_v38  ;;  %v1873_v33 = vpack.c.bf16 %v1230_v31, %v1226_v30  ;;  %v1467_v24 = vld [vmem:[%s2772_s11 + $0x18] sm:$0xff]  ;;  %v1468_v30 = vld [vmem:[%s2772_s11 + $0x20] sm:$0xff]  ;;  %v1469_v31 = vld [vmem:[%s2772_s11 + $0x28] sm:$0xff] }
 0x564   :  { %v1487_v34 = vld [vmem:[%s2772_s11 + $0xb8] sm:$0xff] }
 0x565   :  { %1774 = vmatmul.mubr.msk.f32.vlgmr.msra.gmra.mrb[6].mxu1 %vm313_vm2, %v745_v32  ;;  %1858 = vmatpush3.bf16.msra.mxu0 %v1855_v38  ;;  %v1887_v32 = vpack.c.bf16 %v1233_v29, %v1229_v27  ;;  %v1239_v38 = vld [vmem:[%s2770_s9 + $0xa8] sm:$0xff]  ;;  %v1484_v27 = vld [vmem:[%s2772_s11 + $0xa0] sm:$0xff] }
 0x566   :  { %1342 = vmatprep.mubr.f32.mxu1 %v2187_v25  ;;  %1860 = vmatprep.subr.bf16.mxu0 %v1859_v43 }
 0x569   :  { %1862 = vmatpush3.bf16.msra.mxu0 %v1859_v43  ;;  %v1238_v43 = vld [vmem:[%s2770_s9 + $0xa0] sm:$0xff] }
 0x56a   :  { %1864 = vmatprep.subr.bf16.mxu0 %v1863_v48  ;;  %v1877_v47 = vpack.c.bf16 %v1238_v43, %v1234_v42  ;;  %v1472_v42 = vld [vmem:[%s2772_s11 + $0x40] sm:$0xff]  ;;  %v1473_v43 = vld [vmem:[%s2772_s11 + $0x48] sm:$0xff] }
 0x56d   :  { %1866 = vmatpush3.bf16.msra.mxu0 %v1863_v48  ;;  %v1236_v48 = vld [vmem:[%s2770_s9 + $0x90] sm:$0xff] }
 0x56e   :  { %1884 = vmatprep.subr.bf16.mxu0 %v1883_v19 }
 0x5c5   :  { %v1754_v39 = vpop.f32.mrb[8].mxu0 }
 0x5c6   :  { %v818_v40 = vpop.f32.mrb[9].mxu0 }
 0x633   :  { %v1768_v50 = vpop.f32.mrb[10].mxu0 }
 0x634   :  { %v1761_v51 = vpop.f32.mrb[4].mxu1  ;;  %v980_v52 = vpop.f32.mrb[11].mxu0 }
 0x635   :  { %1074 = vrot.lane.b32.xlu1 %v1761_v51, %s2194_s27  ;;  %v899_v53 = vpop.f32.mrb[5].mxu1 }
 0x636   :  { %1072 = vrot.lane.b32.xlu0 %v899_v53, %s2194_s27  ;;  %v1247_v53 = vld [vmem:[%s2770_s9 + $0xe8] sm:$0xff] }
 0x638   :  { %v1775_v54 = vpop.f32.mrb[6].mxu1 }
 0x639   :  { %1082 = vrot.lane.b32.xlu1 %v1768_v50, %s2195_s8  ;;  %v1061_v55 = vpop.f32.mrb[7].mxu1  ;;  %v1240_v50 = vld [vmem:[%s2770_s9 + $0xb0] sm:$0xff] }
 0x63a   :  { %1080 = vrot.lane.b32.xlu0 %v980_v52, %s2195_s8  ;;  %v1893_v51 = vpack.c.bf16 %v1240_v50, %v1236_v48  ;;  %v1243_v52 = vld [vmem:[%s2770_s9 + $0xc8] sm:$0xff]  ;;  %v1491_v48 = vld [vmem:[%s2772_s11 + $0xd8] sm:$0xff] }
 0x63d   :  { %1090 = vrot.lane.b32.xlu1 %v1775_v54, %s2196_s4  ;;  %v1245_v54 = vld [vmem:[%s2770_s9 + $0xd8] sm:$0xff] }
 0x63e   :  { %1088 = vrot.lane.b32.xlu0 %v1061_v55, %s2196_s4  ;;  %v1879_v55 = vpack.c.bf16 %v1247_v53, %v1243_v52  ;;  %v1475_v52 = vld [vmem:[%s2772_s11 + $0x58] sm:$0xff] }
 0x6a7   :  { %v1075_v56 = vpop.permute.xlu1 %1074 }
 0x6a8   :  { %v1073_v57 = vpop.permute.xlu0 %1072  ;;  %v1095_v63 = vsel %vm313_vm2, %v1754_v39, %v1075_v56  ;;  %v1237_v39 = vld [vmem:[%s2770_s9 + $0x98] sm:$0xff] }
 0x6a9   :  { %v1094_v62 = vsel %vm313_vm2, %v818_v40, %v1073_v57  ;;  %v1875_v40 = vpack.c.bf16 %v1239_v38, %v1235_v37  ;;  %v1891_v44 = vpack.c.bf16 %v1241_v41, %v1237_v39  ;;  %v1249_v56 = vld [vmem:[%s2770_s9 + $0xf8] sm:$0xff]  ;;  %v1242_v57 = vld [vmem:[%s2770_s9 + $0xc0] sm:$0xff] }
 0x6aa   :  { %v1471_v37 = vld [vmem:[%s2772_s11 + $0x38] sm:$0xff]  ;;  %v1488_v39 = vld [vmem:[%s2772_s11 + $0xc0] sm:$0xff] }
 0x6ab   :  { %v1083_v58 = vpop.permute.xlu1 %1082 }
 0x6ac   :  { %v1081_v61 = vpop.permute.xlu0 %1080  ;;  %v1098_v4 = vsel %vm1096_vm4, %v1095_v63, %v1083_v58  ;;  %v1246_v58 = vld [vmem:[%s2770_s9 + $0xe0] sm:$0xff]  ;;  %v1248_v63 = vld [vmem:[%s2770_s9 + $0xf0] sm:$0xff] }
 0x6ad   :  { %v1097_v2 = vsel %vm1096_vm4, %v1094_v62, %v1081_v61  ;;  %v1895_v61 = vpack.c.bf16 %v1249_v56, %v1245_v54  ;;  %v1881_v62 = vpack.c.bf16 %v1246_v58, %v1242_v57  ;;  %v1492_v54 = vld [vmem:[%s2772_s11 + $0xe0] sm:$0xff]  ;;  %v1477_v58 = vld [vmem:[%s2772_s11 + $0x68] sm:$0xff] }
 0x6ae   :  { %v1476_v57 = vld [vmem:[%s2772_s11 + $0x60] sm:$0xff] }
 0x6af   :  { %v1091_v59 = vpop.permute.xlu1 %1090 }
 0x6b0   :  { %v1089_v3 = vpop.permute.xlu0 %1088  ;;  %v1101_v6 = vsel %vm1099_vm5, %v1098_v4, %v1091_v59  ;;  %v1244_v59 = vld [vmem:[%s2770_s9 + $0xd0] sm:$0xff] }
 0x6b1   :  { %v1100_v5 = vsel %vm1099_vm5, %v1097_v2, %v1089_v3  ;;  %v1897_v2 = vpack.c.bf16 %v1248_v63, %v1244_v59  ;;  %v1495_v59 = vld [vmem:[%s2772_s11 + $0xf8] sm:$0xff] }
 0x6b2   :  { %1792 = vmatprep.mubr.msk.f32.mxu0 %vm114_vm0, %v1100_v5 }
 0x6b3   :  { %1793 = vmatmul.mubr.msk.f32.vlgmr.msra.gmra.mrb[12].mxu0 %vm114_vm0, %v1101_v6 }
 0x6b4   :  { %1419 = vmatprep.mubr.f32.mxu0 %v2187_v25  ;;  %1886 = vmatpush1.bf16.msra.mxu0 %v1885_v23  ;;  %v1466_v23 = vld [vmem:[%s2772_s11 + $0x10] sm:$0xff] }
 0x6b5   :  { %1888 = vmatprep.subr.bf16.mxu0 %v1887_v32  ;;  %v1905_v26 = vpack.c.bf16 %v1467_v24, %v1466_v23  ;;  %v1909_v32 = vpack.c.bf16 %v1469_v31, %v1468_v30  ;;  %v1266_v30 = vsub.s32 3, %v2410_v45 }
 0x6b8   :  { %1890 = vmatpush1.bf16.msra.mxu0 %v1889_v36  ;;  %v1470_v36 = vld [vmem:[%s2772_s11 + $0x30] sm:$0xff] }
 0x6b9   :  { %1892 = vmatprep.subr.bf16.mxu0 %v1891_v44  ;;  %v1913_v38 = vpack.c.bf16 %v1471_v37, %v1470_v36  ;;  %v1917_v44 = vpack.c.bf16 %v1473_v43, %v1472_v42 }
 0x6bc   :  { %1894 = vmatpush1.bf16.msra.mxu0 %v1893_v51  ;;  %v1474_v51 = vld [vmem:[%s2772_s11 + $0x50] sm:$0xff] }
 0x6bd   :  { %1896 = vmatprep.subr.bf16.mxu0 %v1895_v61  ;;  %v1921_v53 = vpack.c.bf16 %v1475_v52, %v1474_v51  ;;  %v1925_v61 = vpack.c.bf16 %v1477_v58, %v1476_v57  ;;  %v1639_v52 = vld [vmem:[%s2773_s12] ss:$0 sm:$0xff] }
 0x6c0   :  { %1898 = vmatpush1.bf16.msra.mxu0 %v1897_v2  ;;  %v1478_v2 = vld [vmem:[%s2772_s11 + $0x70] sm:$0xff] }
 0x786   :  { %v1794_v60 = vpop.f32.mrb[12].mxu0 }
 0x787   :  { %v2519_v7 = vadd.f32 %v1794_v60, %v2345_v1  ;;  %v1182_v8 = vpop.f32.mrb[13].mxu0  ;;  %v1219_v1 = vld [vmem:[%s2770_s9 + $0x8] sm:$0xff] }
 0x788   :  { %v2522_v9 = vadd.f32 %v1182_v8, %v2340_v0  ;;  %v1223_v0 = vld [vmem:[%s2770_s9 + $0x28] sm:$0xff] }
 0x789   :  { %v1195_v10 = vmul.f32 %v2519_v7, %v2519_v7  ;;  %v1867_v15 = vpack.c.bf16 %v1223_v0, %v1219_v1 }
 0x78a   :  { %v1194_v11 = vmul.f32 %v2522_v9, %v2522_v9 }
 0x78b   :  { %v1199_v12 = vsel %vm114_vm0, %v1195_v10, 0.0  ;;  %1868 = vmatprep.subr.bf16.mxu1 %v1867_v15  ;;  %v1480_v15 = vld [vmem:[%s2772_s11 + $0x80] sm:$0xff] }
 0x78c   :  { %1200 = vadd.xlane.f32.xlu1 %v1199_v12  ;;  %v1196_v13 = vsel %vm114_vm0, %v1194_v11, 0.0  ;;  %1870 = vmatpush1.bf16.msra.mxu1 %v1869_v20  ;;  %v1630_v12 = vld [vmem:[#allocation7] ss:$0 sm:$0xff]  ;;  %v1899_v17 = vpack.c.bf16 %v1481_v16, %v1480_v15 }
 0x78d   :  { %1197 = vadd.xlane.f32.xlu0 %v1196_v13  ;;  %1872 = vmatprep.subr.bf16.mxu1 %v1871_v28  ;;  %v1482_v20 = vld [vmem:[%s2772_s11 + $0x90] sm:$0xff]  ;;  %v1485_v28 = vld [vmem:[%s2772_s11 + $0xa8] sm:$0xff] }
 0x78e   :  { %v1903_v22 = vpack.c.bf16 %v1483_v21, %v1482_v20  ;;  %v1907_v29 = vpack.c.bf16 %v1485_v28, %v1484_v27  ;;  %v1262_v28 = vsub.s32 2, %v2410_v45 }
 0x790   :  { %1874 = vmatpush1.bf16.msra.mxu1 %v1873_v33  ;;  %v1486_v33 = vld [vmem:[%s2772_s11 + $0xb0] sm:$0xff] }
 0x791   :  { %1876 = vmatprep.subr.bf16.mxu1 %v1875_v40  ;;  %v1911_v35 = vpack.c.bf16 %v1487_v34, %v1486_v33  ;;  %v1489_v40 = vld [vmem:[%s2772_s11 + $0xc8] sm:$0xff] }
 0x792   :  { %v1915_v41 = vpack.c.bf16 %v1489_v40, %v1488_v39 }
 0x794   :  { %1878 = vmatpush1.bf16.msra.mxu1 %v1877_v47  ;;  %v1490_v47 = vld [vmem:[%s2772_s11 + $0xd0] sm:$0xff] }
 0x795   :  { %1880 = vmatprep.subr.bf16.mxu1 %v1879_v55  ;;  %v1919_v50 = vpack.c.bf16 %v1491_v48, %v1490_v47  ;;  %v1493_v55 = vld [vmem:[%s2772_s11 + $0xe8] sm:$0xff] }
 0x796   :  { %v1923_v56 = vpack.c.bf16 %v1493_v55, %v1492_v54 }
 0x798   :  { %1882 = vmatpush1.bf16.msra.mxu1 %v1881_v62  ;;  %v1494_v62 = vld [vmem:[%s2772_s11 + $0xf0] sm:$0xff] }
 0x799   :  { %1900 = vmatprep.subr.bf16.mxu1 %v1899_v17  ;;  %v1927_v63 = vpack.c.bf16 %v1495_v59, %v1494_v62 }
 0x819   :  { %v1201_v3 = vpop.xlane.xlu1 %1200 }
 0x81a   :  { %v1203_v4 = vmul.f32 0.015625, %v1201_v3  ;;  %v1198_v5 = vpop.xlane.xlu0 %1197  ;;  %v1479_v3 = vld [vmem:[%s2772_s11 + $0x78] sm:$0xff] }
 0x81b   :  { %v1202_v6 = vmul.f32 0.015625, %v1198_v5  ;;  %v1250_v5 = vld [vmem:[%s2771_s10] sm:$0xf] }
 0x81c   :  { %v1205_v60 = vadd.f32 1e-05, %v1203_v4  ;;  %v1929_v4 = vpack.c.bf16 %v1479_v3, %v1478_v2  ;;  %v1263_v31 = vrot.slane %v1250_v5, %v1262_v28 }
 0x81d   :  { %v1204_v8 = vadd.f32 1e-05, %v1202_v6  ;;  %v1255_v6 = vrot.slane %v1250_v5, %v158_v46 }
 0x81e   :  { %2020 = vrsqrt.f32 %v1205_v60  ;;  %v1259_v60 = vrot.slane %v1250_v5, %v162_v49 }
 0x81f   :  { %2022 = vrsqrt.f32 %v1204_v8 }
 0x828   :  { %v2021_v10 = vpop.eup %2020 }
 0x829   :  { %v2023_v11 = vpop.eup %2022  ;;  %v1209_v0 = vmul.f32 %v2021_v10, %v2519_v7 }
 0x82a   :  { %v1208_v13 = vmul.f32 %v2023_v11, %v2522_v9 }
 0x82b   :  { %v1217_v14 = vmul.f32 %v1630_v12, %v1209_v0 }
 0x82c   :  { %v1216_v1 = vmul.f32 %v1630_v12, %v1208_v13 }
 0x82e   :  { %1631 = vmatmul.mubr.msk.f32.vlgmr.msra.gmra.mrb[8].mxu1 %vm114_vm0, %v1216_v1  ;;  %1633 = vmatmul.mubr.msk.f32.vlgmr.msra.gmra.mrb[14].mxu0 %vm114_vm0, %v1216_v1 }
 0x82f   :  { %1348 = vmatprep.mubr.f32.mxu1 %v2187_v25  ;;  %1425 = vmatprep.mubr.f32.mxu0 %v2187_v25  ;;  %v1465_v25 = vld [vmem:[%s2772_s11 + $0x8] sm:$0xff] }
 0x830   :  { %v1901_v19 = vpack.c.bf16 %v1465_v25, %v1464_v18 }
 0x832   :  { %1632 = vmatmul.mubr.msk.f32.gmra.mrb[10].mxu1 %vm114_vm0, %v1217_v14  ;;  %1634 = vmatmul.mubr.msk.f32.gmra.mrb[16].mxu0 %vm114_vm0, %v1217_v14 }
 0x833   :  { %1902 = vmatpush3.bf16.msra.mxu1 %v1901_v19 }
 0x834   :  { %1904 = vmatprep.subr.bf16.mxu1 %v1903_v22 }
 0x837   :  { %1906 = vmatpush3.bf16.msra.mxu1 %v1905_v26 }
 0x838   :  { %1908 = vmatprep.subr.bf16.mxu1 %v1907_v29 }
 0x83b   :  { %1910 = vmatpush3.bf16.msra.mxu1 %v1909_v32  ;;  %v1267_v32 = vrot.slane %v1250_v5, %v1266_v30 }
 0x83c   :  { %1912 = vmatprep.subr.bf16.mxu1 %v1911_v35 }
 0x83f   :  { %1914 = vmatpush3.bf16.msra.mxu1 %v1913_v38 }
 0x840   :  { %1916 = vmatprep.subr.bf16.mxu1 %v1915_v41 }
 0x843   :  { %1918 = vmatpush3.bf16.msra.mxu1 %v1917_v44 }
 0x844   :  { %1920 = vmatprep.subr.bf16.mxu1 %v1919_v50 }
 0x847   :  { %1922 = vmatpush3.bf16.msra.mxu1 %v1921_v53 }
 0x848   :  { %1924 = vmatprep.subr.bf16.mxu1 %v1923_v56 }
 0x84b   :  { %1926 = vmatpush3.bf16.msra.mxu1 %v1925_v61 }
 0x84c   :  { %1928 = vmatprep.subr.bf16.mxu1 %v1927_v63 }
 0x84f   :  { %1930 = vmatpush3.bf16.msra.mxu1 %v1929_v4 }
 0x901   :  { %v1344_v8 = vpop.f32.mrb[8].mxu1  ;;  %v1421_v10 = vpop.f32.mrb[14].mxu0 }
 0x902   :  { %v1345_v11 = vadd.f32 %v1344_v8, %v1255_v6  ;;  %v1346_v12 = vpop.f32.mrb[9].mxu1  ;;  %v1423_v13 = vpop.f32.mrb[15].mxu0  ;;  %v1422_v36 = vadd.f32 %v1421_v10, %v1263_v31 }
 0x903   :  { %v1347_v1 = vadd.f32 %v1346_v12, %v1259_v60  ;;  %v1424_v38 = vadd.f32 %v1423_v13, %v1267_v32 }
 0x904   :  { %v1635_v0 = vmul.f32 -1.442695, %v1345_v11 }
 0x905   :  { %v1636_v14 = vmul.f32 -1.442695, %v1347_v1  ;;  %v1350_v15 = vpop.f32.mrb[10].mxu1  ;;  %v1427_v16 = vpop.f32.mrb[16].mxu0 }
 0x906   :  { %2024 = vpow2.f32 %v1635_v0  ;;  %v1351_v17 = vadd.f32 %v1350_v15, %v1255_v6  ;;  %v1352_v18 = vpop.f32.mrb[11].mxu1  ;;  %v1429_v25 = vpop.f32.mrb[17].mxu0  ;;  %v1428_v44 = vadd.f32 %v1427_v16, %v1263_v31 }
 0x907   :  { %2026 = vpow2.f32 %v1636_v14  ;;  %v1353_v19 = vadd.f32 %v1352_v18, %v1259_v60  ;;  %v1430_v48 = vadd.f32 %v1429_v25, %v1267_v32 }
 0x908   :  { %v1637_v46 = vmul.f32 -1.442695, %v1351_v17 }
 0x909   :  { %v1638_v20 = vmul.f32 -1.442695, %v1353_v19 }
 0x90a   :  { %2028 = vpow2.f32 %v1637_v46 }
 0x90b   :  { %2030 = vpow2.f32 %v1638_v20 }
 0x910   :  { %v2025_v49 = vpop.eup %2024 }
 0x911   :  { %v2027_v21 = vpop.eup %2026  ;;  %v1444_v22 = vadd.f32 1.0, %v2025_v49 }
 0x912   :  { %v1445_v23 = vadd.f32 1.0, %v2027_v21 }
 0x913   :  { %2032 = vrcp.f32 %v1444_v22 }
 0x914   :  { %v2029_v24 = vpop.eup %2028  ;;  %2034 = vrcp.f32 %v1445_v23 }
 0x915   :  { %v2031_v26 = vpop.eup %2030  ;;  %v1446_v27 = vadd.f32 1.0, %v2029_v24 }
 0x916   :  { %v1447_v29 = vadd.f32 1.0, %v2031_v26 }
 0x917   :  { %2036 = vrcp.f32 %v1446_v27 }
 0x918   :  { %2038 = vrcp.f32 %v1447_v29 }
 0x91d   :  { %v2033_v33 = vpop.eup %2032 }
 0x91e   :  { %v2035_v34 = vpop.eup %2034  ;;  %v1456_v35 = vmul.f32 %v2033_v33, %v1345_v11 }
 0x91f   :  { %v1457_v37 = vmul.f32 %v2035_v34, %v1347_v1 }
 0x920   :  { %v1460_v39 = vmul.f32 %v1456_v35, %v1422_v36 }
 0x921   :  { %v2037_v40 = vpop.eup %2036  ;;  %v1461_v41 = vmul.f32 %v1457_v37, %v1424_v38 }
 0x922   :  { %v2039_v42 = vpop.eup %2038  ;;  %v1458_v43 = vmul.f32 %v2037_v40, %v1351_v17 }
 0x923   :  { %v1459_v47 = vmul.f32 %v2039_v42, %v1353_v19  ;;  %1567 = vmatprep.mubr.f32.mxu1 %v1461_v41 }
 0x924   :  { %v1462_v45 = vmul.f32 %v1458_v43, %v1428_v44  ;;  %1568 = vmatmul.mubr.f32.vlgmr.msra.gmra.mrb[12].mxu1 %v1460_v39 }
 0x925   :  { %v1463_v50 = vmul.f32 %v1459_v47, %v1430_v48 }
 0x927   :  { %1572 = vmatprep.mubr.f32.mxu1 %v1463_v50 }
 0x928   :  { %1573 = vmatmul.mubr.f32.gmra.mrb[14].mxu1 %v1462_v45 }
 0x9f7   :  { %v1714_v51 = vpop.f32.mrb[12].mxu1 }
 0x9f8   :  { %v1715_v53 = vpop.f32.mrb[13].mxu1 }
 0x9f9   :  { %v1716_v54 = vadd.f32 %v1715_v53, %v1714_v51 }
 0x9fb   :  { %v1570_v55 = vadd.f32 %v1716_v54, %v1639_v52  ;;  %v1717_v56 = vpop.f32.mrb[14].mxu1 }
 0x9fc   :  { %v1718_v57 = vpop.f32.mrb[15].mxu1 }
 0x9fd   :  { %v1578_v58 = vadd.f32 %v1570_v55, %v2522_v9  ;;  %v1719_v61 = vadd.f32 %v1718_v57, %v1717_v56 }
 0x9ff   :  { %1580 = vst.msk [vmem:[#allocation11] sm:$0xff] %vm114_vm0, %v1578_v58  ;;  %v1575_v62 = vadd.f32 %v1719_v61, %v1639_v52 }
 0xa01   :  { %v1579_v59 = vadd.f32 %v1575_v62, %v2519_v7 }
 0xa03   :  { %1581 = vst.msk [vmem:[#allocation11 + $0x8] sm:$0xff] %vm114_vm0, %v1579_v59 }
 0xa04   :  { %2161 = shalt.err (!%p2158_p2)
}
 0xa05   :  { %s2162_s1 = scalar_lea.hbm %s2774_s13, 256 }
 0xa06   :  { %p2163_p3 = scmp.ne.s32.totalorder %s2774_s13, %s2162_s1  ;;  %p2166_p4 = scmp.lt.u32.totalorder %s2162_s1, %s2774_s13 }
 0xa08   :  { %p2168_p5 = pnand %p2166_p4, %p2163_p3 }
 0xa0a   :  { %2171 = shalt.err (!%p2168_p5)
}
 0xa0b   :  { %1593 = dma.vmem_to_hbm [thread:$0]  %s1588_s14, 256, %s2774_s13, [#allocation4], %s2181_s18, %s2181_s18, %s2182_s19  }
 0xa0c   :  { %2178 = dma.done.wait [#allocation4], 256  }
 0xa0d   :  { %2179 = vsyncadd [#allocation4], 4294967040 }
 0xa0e   :  { %1597 = vsyncpa [#allocation3], 1 }
 0xa0f   :  { %1598 = vsyncpa [#allocation6], 1 }
 0xa10   :  { %1599 = vsyncpa [#allocation9], 1 }
 0xa11   :  { %1600 = vsyncpa [#allocation4], 1 }

</bundles_post_ra>
